<compile_context>
chip_gen: v7x
topology: tpu7x:2x2x1
jax: 0.10.0
libtpu: 0.0.40
codegen_flags: <defaults>
</compile_context>

<pallas_src>
import functools

import numpy as np
import jax
import jax.numpy as jnp
from jax.experimental import pallas as pl
from jax.experimental.pallas import tpu as pltpu

Batch_size = 2  # matches the PyTorch script's global


# ----------------------------------------------------------------------------- kernel
def make_bigru_kernel(T, B, H):
    def kernel(x_ref, len_ref, wih_ref, bx_ref, whh_ref, bhn_ref,
               wlin_ref, blin_ref, out_ref):
        """Bidirectional single-layer GRU over a padded batch + final Linear.

        x_ref    : (T*B, E)    f32   time-major embedded inputs (flattened)
        len_ref  : (B, 1)      i32   per-example valid lengths
        wih_ref  : (E, 6H)     f32   columns [f_r|f_z|f_n|b_r|b_z|b_n]
        bx_ref   : (1, 6H)     f32   bih (+ bhh for r,z; n keeps bhh separate)
        whh_ref  : (2, H, 3H)  f32   per-direction fused hidden weights [r|z|n]
        bhn_ref  : (2, 1, H)   f32   bhh_n per direction (scaled by r)
        wlin_ref : (2, H, Opad)f32   Linear weights split per direction, lane-padded
        blin_ref : (1, Opad)   f32
        out_ref  : (B, Opad)   f32
        """
        lens = len_ref[...]                                   # (B, 1) int32

        # Hoisted input projection: one matmul covers all T steps, both directions,
        # all three gates.  (T*B, E) @ (E, 6H) -> (T*B, 6H).
        xg = (jnp.dot(x_ref[...], wih_ref[...],
                      preferred_element_type=jnp.float32)
              + bx_ref[...])

        whh = whh_ref[...]                                    # (2, H, 3H)
        bhn = bhn_ref[...]                                    # (2, 1, H)

        def cell(gx, h, d):
            # PyTorch GRU cell with fused gate matmul:
            #   gh = h @ [W_hr | W_hz | W_hn]
            #   r  = sigma(gx_r + gh_r)              (gx_r already has b_ir + b_hr)
            #   z  = sigma(gx_z + gh_z)
            #   n  = tanh (gx_n + r * (gh_n + b_hn)) (gx_n has b_in only)
            #   h' = (1 - z) * n + z * h
            gh = jnp.dot(h, whh[d], preferred_element_type=jnp.float32)  # (B, 3H)
            r = jax.nn.sigmoid(gx[:, 0:H] + gh[:, 0:H])
            z = jax.nn.sigmoid(gx[:, H:2 * H] + gh[:, H:2 * H])
            n = jnp.tanh(gx[:, 2 * H:3 * H] + r * (gh[:, 2 * H:3 * H] + bhn[d]))
            return (1.0 - z) * n + z * h

        h_f = jnp.zeros((B, H), jnp.float32)
        h_b = jnp.zeros((B, H), jnp.float32)

        # Merged fwd+bwd recurrence, fully unrolled (T static, tiny carry state):
        # all slices below are static, and the two chains interleave on the MXU.
        for t in range(T):
            tb = T - 1 - t
            gx_f = xg[t * B:(t + 1) * B, 0:3 * H]             # fwd gates at time t
            gx_b = xg[tb * B:(tb + 1) * B, 3 * H:6 * H]       # bwd gates at time tb
            hf_new = cell(gx_f, h_f, 0)
            hb_new = cell(gx_b, h_b, 1)
            # packed-sequence semantics: only update while the step is valid
            h_f = jnp.where(t < lens, hf_new, h_f)
            h_b = jnp.where(tb < lens, hb_new, h_b)

        # Linear on cat(h_f, h_b) without the lane concat: two dots summed.
        out_ref[...] = (jnp.dot(h_f, wlin_ref[0], preferred_element_type=jnp.float32)
                        + jnp.dot(h_b, wlin_ref[1], preferred_element_type=jnp.float32)
                        + blin_ref[...])

    return kernel


# ----------------------------------------------------------------------------- wrapper
OUT_PAD = 128  # lane-pad the output/Linear columns for unmasked stores


@jax.jit
def model_forward(x, seq_length, params):
    """x: (B, T) int32 token ids; seq_length: (B,) int32 (sorted descending)."""
    B, T = x.shape
    E = params["emb"].shape[1]
    H = params["whh"].shape[-1]
    O = params["wlin"].shape[-1]

    # ---- glue: x.t() + embedding lookup (gather), like the PyTorch forward ----
    x_tm = x.T                                            # (T, B)
    x_emb = params["emb"][x_tm].astype(jnp.float32)       # (T, B, E)
    x_flat = x_emb.reshape(T * B, E)                      # time-major, flattened
    len2d = seq_length.reshape(B, 1).astype(jnp.int32)

    # ---- one-time weight repacking (tiny; fused under jit) ----
    wih, whh = params["wih"], params["whh"]               # (6,E,H), (6,H,H)
    bih, bhh = params["bih"], params["bhh"]               # (6,1,H), (6,1,H)

    # (E, 6H) with column blocks [f_r|f_z|f_n|b_r|b_z|b_n]
    wih_p = jnp.transpose(wih, (1, 0, 2)).reshape(E, 6 * H)
    # fold bih (+ bhh for r,z) into the precomputed gate inputs; bhh_n stays separate
    bhh_rz = bhh.at[2].set(0.0).at[5].set(0.0)
    bx_p = (bih + bhh_rz).reshape(1, 6 * H)
    # per-direction fused hidden weights (2, H, 3H)
    whh_p = whh.reshape(2, 3, H, H).transpose(0, 2, 1, 3).reshape(2, H, 3 * H)
    bhn_p = jnp.stack([bhh[2], bhh[5]])                   # (2, 1, H)

    # Linear split per direction + lane-padded to OUT_PAD columns
    wlin = params["wlin"]                                  # (2H, O)
    wlin_p = jnp.zeros((2, H, OUT_PAD), jnp.float32)
    wlin_p = wlin_p.at[0, :, :O].set(wlin[:H])
    wlin_p = wlin_p.at[1, :, :O].set(wlin[H:])
    blin_p = jnp.zeros((1, OUT_PAD), jnp.float32).at[:, :O].set(params["blin"])

    vmem = pl.BlockSpec(memory_space=pltpu.MemorySpace.VMEM)
    out = pl.pallas_call(
        make_bigru_kernel(T, B, H),
        out_shape=jax.ShapeDtypeStruct((B, OUT_PAD), jnp.float32),
        in_specs=[vmem] * 8,
        out_specs=vmem,
    )(x_flat, len2d, wih_p, bx_p, whh_p, bhn_p, wlin_p, blin_p)

    # output_l.view(-1, output_size)
    return out[:, :O].reshape(-1, O)


# ----------------------------------------------------------------------------- reference
def model_forward_ref(x, seq_length, params):
    """Pure-JAX reference of the same math (for verification)."""
    x_emb = params["emb"][x.T].astype(jnp.float32)  # (T, B, E)
    T, B, _ = x_emb.shape
    H = params["whh"].shape[-1]
    wih, whh, bih, bhh = params["wih"], params["whh"], params["bih"], params["bhh"]
    lens = seq_length.reshape(B, 1)

    def cell(x_t, h, d):
        r = jax.nn.sigmoid(x_t @ wih[3 * d + 0] + bih[3 * d + 0] + h @ whh[3 * d + 0] + bhh[3 * d + 0])
        z = jax.nn.sigmoid(x_t @ wih[3 * d + 1] + bih[3 * d + 1] + h @ whh[3 * d + 1] + bhh[3 * d + 1])
        n = jnp.tanh(x_t @ wih[3 * d + 2] + bih[3 * d + 2] + r * (h @ whh[3 * d + 2] + bhh[3 * d + 2]))
        return (1.0 - z) * n + z * h

    h_f = jnp.zeros((B, H), jnp.float32)
    for t in range(T):
        h_f = jnp.where(t < lens, cell(x_emb[t], h_f, 0), h_f)
    h_b = jnp.zeros((B, H), jnp.float32)
    for i in range(T):
        t = T - 1 - i
        h_b = jnp.where(t < lens, cell(x_emb[t], h_b, 1), h_b)
    h_cat = jnp.concatenate([h_f, h_b], axis=1)
    out = h_cat @ params["wlin"] + params["blin"]
    return out.reshape(-1, params["wlin"].shape[-1])


# ----------------------------------------------------------------------------- params
def init_params(key, vocab, emb_size, hidden_size, output_size):
    ks = jax.random.split(key, 8)
    s = 1.0 / np.sqrt(hidden_size)
    u = lambda k, shape: jax.random.uniform(k, shape, jnp.float32, -s, s)
    return {
        "emb":  jax.random.normal(ks[0], (vocab, emb_size), jnp.float32),
        # [dir*3 + gate] with gate order (r, z, n); dir 0 = forward, 1 = reverse
        "wih":  u(ks[1], (6, emb_size, hidden_size)),
        "whh":  u(ks[2], (6, hidden_size, hidden_size)),
        "bih":  u(ks[3], (6, 1, hidden_size)),
        "bhh":  u(ks[4], (6, 1, hidden_size)),
        "wlin": u(ks[5], (2 * hidden_size, output_size)),
        "blin": u(ks[6], (1, output_size)),
    }


# ----------------------------------------------------------------------------- main
if __name__ == "__main__":
    vocab_size = 128      # input_size  (ASCII)
    emb_size = 16         # embedding_size
    hidden_size = 32      # hidden_size
    output_size = 18      # number of countries
    B, T = Batch_size, 8  # batch, padded sequence length

    key = jax.random.PRNGKey(0)
    k_p, k_x = jax.random.split(key)
    params = init_params(k_p, vocab_size, emb_size, hidden_size, output_size)

    x = jax.random.randint(k_x, (B, T), 0, vocab_size, dtype=jnp.int32)
    # pack_padded_sequence expects lengths sorted in decreasing order
    seq_length = jnp.array([T, 5], dtype=jnp.int32)

    out = model_forward(x, seq_length, params)
    out = jax.block_until_ready(out)

    ref = model_forward_ref(x, seq_length, params)
    assert out.shape == (B, output_size), out.shape
    np.testing.assert_allclose(np.asarray(out), np.asarray(ref), rtol=1e-4, atol=1e-4)
    print("KERNEL_OK")
</pallas_src>

<mosaic_0001>
module attributes {stable_mosaic.version = 11 : i64} {
  func.func @kernel(%arg0: memref<16x16xf32, #tpu.memory_space<vmem>>, %arg1: memref<2x1xi32, #tpu.memory_space<vmem>>, %arg2: memref<16x192xf32, #tpu.memory_space<vmem>>, %arg3: memref<1x192xf32, #tpu.memory_space<vmem>>, %arg4: memref<2x32x96xf32, #tpu.memory_space<vmem>>, %arg5: memref<2x1x32xf32, #tpu.memory_space<vmem>>, %arg6: memref<2x32x128xf32, #tpu.memory_space<vmem>>, %arg7: memref<1x128xf32, #tpu.memory_space<vmem>>, %arg8: memref<2x128xf32, #tpu.memory_space<vmem>>) attributes {dimension_semantics = [], scalar_prefetch = 0 : i64, scratch_operands = 0 : i64, tpu.core_type = #tpu.core_type<tc>} {
    %c0 = arith.constant 0 : index
    %c0_0 = arith.constant 0 : index
    %0 = vector.load %arg1[%c0, %c0_0] : memref<2x1xi32, #tpu.memory_space<vmem>>, vector<2x1xi32>
    %c0_1 = arith.constant 0 : index
    %c0_2 = arith.constant 0 : index
    %1 = vector.load %arg0[%c0_1, %c0_2] : memref<16x16xf32, #tpu.memory_space<vmem>>, vector<16x16xf32>
    %c0_3 = arith.constant 0 : index
    %c0_4 = arith.constant 0 : index
    %2 = vector.load %arg2[%c0_3, %c0_4] : memref<16x192xf32, #tpu.memory_space<vmem>>, vector<16x192xf32>
    %cst = arith.constant dense<0.000000e+00> : vector<16x192xf32>
    %3 = tpu.matmul %1, %2, %cst {dimension_numbers = #tpu.dot_dimension_numbers<[1], [0], [0], [1], [0, 0, 1, 1], [], []>} : vector<16x16xf32>, vector<16x192xf32>, vector<16x192xf32> -> vector<16x192xf32>
    %c0_5 = arith.constant 0 : index
    %c0_6 = arith.constant 0 : index
    %4 = vector.load %arg3[%c0_5, %c0_6] : memref<1x192xf32, #tpu.memory_space<vmem>>, vector<1x192xf32>
    %5 = vector.broadcast %4 : vector<1x192xf32> to vector<16x192xf32>
    %6 = arith.addf %3, %5 : vector<16x192xf32>
    %c0_7 = arith.constant 0 : index
    %c0_8 = arith.constant 0 : index
    %c0_9 = arith.constant 0 : index
    %7 = vector.load %arg4[%c0_7, %c0_8, %c0_9] : memref<2x32x96xf32, #tpu.memory_space<vmem>>, vector<2x32x96xf32>
    %c0_10 = arith.constant 0 : index
    %c0_11 = arith.constant 0 : index
    %c0_12 = arith.constant 0 : index
    %8 = vector.load %arg5[%c0_10, %c0_11, %c0_12] : memref<2x1x32xf32, #tpu.memory_space<vmem>>, vector<2x1x32xf32>
    %cst_13 = arith.constant 0.000000e+00 : f32
    %9 = vector.broadcast %cst_13 : f32 to vector<2x32xf32>
    %cst_14 = arith.constant 0.000000e+00 : f32
    %10 = vector.broadcast %cst_14 : f32 to vector<2x32xf32>
    %11 = vector.extract_strided_slice %6 {offsets = [0, 0], sizes = [2, 96], strides = [1, 1]} : vector<16x192xf32> to vector<2x96xf32>
    %12 = vector.extract_strided_slice %6 {offsets = [14, 96], sizes = [2, 96], strides = [1, 1]} : vector<16x192xf32> to vector<2x96xf32>
    %13 = vector.extract_strided_slice %7 {offsets = [0, 0, 0], sizes = [1, 32, 96], strides = [1, 1, 1]} : vector<2x32x96xf32> to vector<1x32x96xf32>
    %14 = vector.shape_cast %13 : vector<1x32x96xf32> to vector<32x96xf32>
    %cst_15 = arith.constant dense<0.000000e+00> : vector<2x96xf32>
    %15 = tpu.matmul %9, %14, %cst_15 {dimension_numbers = #tpu.dot_dimension_numbers<[1], [0], [0], [1], [0, 0, 1, 1], [], []>} : vector<2x32xf32>, vector<32x96xf32>, vector<2x96xf32> -> vector<2x96xf32>
    %16 = vector.extract_strided_slice %11 {offsets = [0, 0], sizes = [2, 32], strides = [1, 1]} : vector<2x96xf32> to vector<2x32xf32>
    %17 = vector.extract_strided_slice %15 {offsets = [0, 0], sizes = [2, 32], strides = [1, 1]} : vector<2x96xf32> to vector<2x32xf32>
    %18 = arith.addf %16, %17 : vector<2x32xf32>
    %19 = arith.negf %18 : vector<2x32xf32>
    %20 = math.exp %19 : vector<2x32xf32>
    %cst_16 = arith.constant 1.000000e+00 : f32
    %21 = vector.broadcast %cst_16 : f32 to vector<2x32xf32>
    %22 = arith.addf %21, %20 : vector<2x32xf32>
    %23 = arith.divf %21, %22 : vector<2x32xf32>
    %24 = vector.extract_strided_slice %11 {offsets = [0, 32], sizes = [2, 32], strides = [1, 1]} : vector<2x96xf32> to vector<2x32xf32>
    %25 = vector.extract_strided_slice %15 {offsets = [0, 32], sizes = [2, 32], strides = [1, 1]} : vector<2x96xf32> to vector<2x32xf32>
    %26 = arith.addf %24, %25 : vector<2x32xf32>
    %27 = arith.negf %26 : vector<2x32xf32>
    %28 = math.exp %27 : vector<2x32xf32>
    %cst_17 = arith.constant 1.000000e+00 : f32
    %29 = vector.broadcast %cst_17 : f32 to vector<2x32xf32>
    %30 = arith.addf %29, %28 : vector<2x32xf32>
    %31 = arith.divf %29, %30 : vector<2x32xf32>
    %32 = vector.extract_strided_slice %11 {offsets = [0, 64], sizes = [2, 32], strides = [1, 1]} : vector<2x96xf32> to vector<2x32xf32>
    %33 = vector.extract_strided_slice %15 {offsets = [0, 64], sizes = [2, 32], strides = [1, 1]} : vector<2x96xf32> to vector<2x32xf32>
    %34 = vector.extract_strided_slice %8 {offsets = [0, 0, 0], sizes = [1, 1, 32], strides = [1, 1, 1]} : vector<2x1x32xf32> to vector<1x1x32xf32>
    %35 = vector.shape_cast %34 : vector<1x1x32xf32> to vector<1x32xf32>
    %36 = vector.broadcast %35 : vector<1x32xf32> to vector<2x32xf32>
    %37 = arith.addf %33, %36 : vector<2x32xf32>
    %38 = arith.mulf %23, %37 : vector<2x32xf32>
    %39 = arith.addf %32, %38 : vector<2x32xf32>
    %40 = math.tanh %39 : vector<2x32xf32>
    %cst_18 = arith.constant 1.000000e+00 : f32
    %41 = vector.broadcast %cst_18 : f32 to vector<2x32xf32>
    %42 = arith.subf %41, %31 : vector<2x32xf32>
    %43 = arith.mulf %42, %40 : vector<2x32xf32>
    %44 = arith.mulf %31, %9 : vector<2x32xf32>
    %45 = arith.addf %43, %44 : vector<2x32xf32>
    %46 = vector.extract_strided_slice %7 {offsets = [1, 0, 0], sizes = [1, 32, 96], strides = [1, 1, 1]} : vector<2x32x96xf32> to vector<1x32x96xf32>
    %47 = vector.shape_cast %46 : vector<1x32x96xf32> to vector<32x96xf32>
    %cst_19 = arith.constant dense<0.000000e+00> : vector<2x96xf32>
    %48 = tpu.matmul %10, %47, %cst_19 {dimension_numbers = #tpu.dot_dimension_numbers<[1], [0], [0], [1], [0, 0, 1, 1], [], []>} : vector<2x32xf32>, vector<32x96xf32>, vector<2x96xf32> -> vector<2x96xf32>
    %49 = vector.extract_strided_slice %12 {offsets = [0, 0], sizes = [2, 32], strides = [1, 1]} : vector<2x96xf32> to vector<2x32xf32>
    %50 = vector.extract_strided_slice %48 {offsets = [0, 0], sizes = [2, 32], strides = [1, 1]} : vector<2x96xf32> to vector<2x32xf32>
    %51 = arith.addf %49, %50 : vector<2x32xf32>
    %52 = arith.negf %51 : vector<2x32xf32>
    %53 = math.exp %52 : vector<2x32xf32>
    %cst_20 = arith.constant 1.000000e+00 : f32
    %54 = vector.broadcast %cst_20 : f32 to vector<2x32xf32>
    %55 = arith.addf %54, %53 : vector<2x32xf32>
    %56 = arith.divf %54, %55 : vector<2x32xf32>
    %57 = vector.extract_strided_slice %12 {offsets = [0, 32], sizes = [2, 32], strides = [1, 1]} : vector<2x96xf32> to vector<2x32xf32>
    %58 = vector.extract_strided_slice %48 {offsets = [0, 32], sizes = [2, 32], strides = [1, 1]} : vector<2x96xf32> to vector<2x32xf32>
    %59 = arith.addf %57, %58 : vector<2x32xf32>
    %60 = arith.negf %59 : vector<2x32xf32>
    %61 = math.exp %60 : vector<2x32xf32>
    %cst_21 = arith.constant 1.000000e+00 : f32
    %62 = vector.broadcast %cst_21 : f32 to vector<2x32xf32>
    %63 = arith.addf %62, %61 : vector<2x32xf32>
    %64 = arith.divf %62, %63 : vector<2x32xf32>
    %65 = vector.extract_strided_slice %12 {offsets = [0, 64], sizes = [2, 32], strides = [1, 1]} : vector<2x96xf32> to vector<2x32xf32>
    %66 = vector.extract_strided_slice %48 {offsets = [0, 64], sizes = [2, 32], strides = [1, 1]} : vector<2x96xf32> to vector<2x32xf32>
    %67 = vector.extract_strided_slice %8 {offsets = [1, 0, 0], sizes = [1, 1, 32], strides = [1, 1, 1]} : vector<2x1x32xf32> to vector<1x1x32xf32>
    %68 = vector.shape_cast %67 : vector<1x1x32xf32> to vector<1x32xf32>
    %69 = vector.broadcast %68 : vector<1x32xf32> to vector<2x32xf32>
    %70 = arith.addf %66, %69 : vector<2x32xf32>
    %71 = arith.mulf %56, %70 : vector<2x32xf32>
    %72 = arith.addf %65, %71 : vector<2x32xf32>
    %73 = math.tanh %72 : vector<2x32xf32>
    %cst_22 = arith.constant 1.000000e+00 : f32
    %74 = vector.broadcast %cst_22 : f32 to vector<2x32xf32>
    %75 = arith.subf %74, %64 : vector<2x32xf32>
    %76 = arith.mulf %75, %73 : vector<2x32xf32>
    %77 = arith.mulf %64, %10 : vector<2x32xf32>
    %78 = arith.addf %76, %77 : vector<2x32xf32>
    %c0_i32 = arith.constant 0 : i32
    %79 = vector.broadcast %c0_i32 : i32 to vector<2x1xi32>
    %80 = arith.cmpi sgt, %0, %79 : vector<2x1xi32>
    %81 = vector.shape_cast %80 : vector<2x1xi1> to vector<2x1xi1>
    %82 = vector.broadcast %81 : vector<2x1xi1> to vector<2x32xi1>
    %83 = arith.select %82, %45, %9 : vector<2x32xi1>, vector<2x32xf32>
    %c7_i32 = arith.constant 7 : i32
    %84 = vector.broadcast %c7_i32 : i32 to vector<2x1xi32>
    %85 = arith.cmpi sgt, %0, %84 : vector<2x1xi32>
    %86 = vector.shape_cast %85 : vector<2x1xi1> to vector<2x1xi1>
    %87 = vector.broadcast %86 : vector<2x1xi1> to vector<2x32xi1>
    %88 = arith.select %87, %78, %10 : vector<2x32xi1>, vector<2x32xf32>
    %89 = vector.extract_strided_slice %6 {offsets = [2, 0], sizes = [2, 96], strides = [1, 1]} : vector<16x192xf32> to vector<2x96xf32>
    %90 = vector.extract_strided_slice %6 {offsets = [12, 96], sizes = [2, 96], strides = [1, 1]} : vector<16x192xf32> to vector<2x96xf32>
    %91 = vector.extract_strided_slice %7 {offsets = [0, 0, 0], sizes = [1, 32, 96], strides = [1, 1, 1]} : vector<2x32x96xf32> to vector<1x32x96xf32>
    %92 = vector.shape_cast %91 : vector<1x32x96xf32> to vector<32x96xf32>
    %cst_23 = arith.constant dense<0.000000e+00> : vector<2x96xf32>
    %93 = tpu.matmul %83, %92, %cst_23 {dimension_numbers = #tpu.dot_dimension_numbers<[1], [0], [0], [1], [0, 0, 1, 1], [], []>} : vector<2x32xf32>, vector<32x96xf32>, vector<2x96xf32> -> vector<2x96xf32>
    %94 = vector.extract_strided_slice %89 {offsets = [0, 0], sizes = [2, 32], strides = [1, 1]} : vector<2x96xf32> to vector<2x32xf32>
    %95 = vector.extract_strided_slice %93 {offsets = [0, 0], sizes = [2, 32], strides = [1, 1]} : vector<2x96xf32> to vector<2x32xf32>
    %96 = arith.addf %94, %95 : vector<2x32xf32>
    %97 = arith.negf %96 : vector<2x32xf32>
    %98 = math.exp %97 : vector<2x32xf32>
    %cst_24 = arith.constant 1.000000e+00 : f32
    %99 = vector.broadcast %cst_24 : f32 to vector<2x32xf32>
    %100 = arith.addf %99, %98 : vector<2x32xf32>
    %101 = arith.divf %99, %100 : vector<2x32xf32>
    %102 = vector.extract_strided_slice %89 {offsets = [0, 32], sizes = [2, 32], strides = [1, 1]} : vector<2x96xf32> to vector<2x32xf32>
    %103 = vector.extract_strided_slice %93 {offsets = [0, 32], sizes = [2, 32], strides = [1, 1]} : vector<2x96xf32> to vector<2x32xf32>
    %104 = arith.addf %102, %103 : vector<2x32xf32>
    %105 = arith.negf %104 : vector<2x32xf32>
    %106 = math.exp %105 : vector<2x32xf32>
    %cst_25 = arith.constant 1.000000e+00 : f32
    %107 = vector.broadcast %cst_25 : f32 to vector<2x32xf32>
    %108 = arith.addf %107, %106 : vector<2x32xf32>
    %109 = arith.divf %107, %108 : vector<2x32xf32>
    %110 = vector.extract_strided_slice %89 {offsets = [0, 64], sizes = [2, 32], strides = [1, 1]} : vector<2x96xf32> to vector<2x32xf32>
    %111 = vector.extract_strided_slice %93 {offsets = [0, 64], sizes = [2, 32], strides = [1, 1]} : vector<2x96xf32> to vector<2x32xf32>
    %112 = vector.extract_strided_slice %8 {offsets = [0, 0, 0], sizes = [1, 1, 32], strides = [1, 1, 1]} : vector<2x1x32xf32> to vector<1x1x32xf32>
    %113 = vector.shape_cast %112 : vector<1x1x32xf32> to vector<1x32xf32>
    %114 = vector.broadcast %113 : vector<1x32xf32> to vector<2x32xf32>
    %115 = arith.addf %111, %114 : vector<2x32xf32>
    %116 = arith.mulf %101, %115 : vector<2x32xf32>
    %117 = arith.addf %110, %116 : vector<2x32xf32>
    %118 = math.tanh %117 : vector<2x32xf32>
    %cst_26 = arith.constant 1.000000e+00 : f32
    %119 = vector.broadcast %cst_26 : f32 to vector<2x32xf32>
    %120 = arith.subf %119, %109 : vector<2x32xf32>
    %121 = arith.mulf %120, %118 : vector<2x32xf32>
    %122 = arith.mulf %109, %83 : vector<2x32xf32>
    %123 = arith.addf %121, %122 : vector<2x32xf32>
    %124 = vector.extract_strided_slice %7 {offsets = [1, 0, 0], sizes = [1, 32, 96], strides = [1, 1, 1]} : vector<2x32x96xf32> to vector<1x32x96xf32>
    %125 = vector.shape_cast %124 : vector<1x32x96xf32> to vector<32x96xf32>
    %cst_27 = arith.constant dense<0.000000e+00> : vector<2x96xf32>
    %126 = tpu.matmul %88, %125, %cst_27 {dimension_numbers = #tpu.dot_dimension_numbers<[1], [0], [0], [1], [0, 0, 1, 1], [], []>} : vector<2x32xf32>, vector<32x96xf32>, vector<2x96xf32> -> vector<2x96xf32>
    %127 = vector.extract_strided_slice %90 {offsets = [0, 0], sizes = [2, 32], strides = [1, 1]} : vector<2x96xf32> to vector<2x32xf32>
    %128 = vector.extract_strided_slice %126 {offsets = [0, 0], sizes = [2, 32], strides = [1, 1]} : vector<2x96xf32> to vector<2x32xf32>
    %129 = arith.addf %127, %128 : vector<2x32xf32>
    %130 = arith.negf %129 : vector<2x32xf32>
    %131 = math.exp %130 : vector<2x32xf32>
    %cst_28 = arith.constant 1.000000e+00 : f32
    %132 = vector.broadcast %cst_28 : f32 to vector<2x32xf32>
    %133 = arith.addf %132, %131 : vector<2x32xf32>
    %134 = arith.divf %132, %133 : vector<2x32xf32>
    %135 = vector.extract_strided_slice %90 {offsets = [0, 32], sizes = [2, 32], strides = [1, 1]} : vector<2x96xf32> to vector<2x32xf32>
    %136 = vector.extract_strided_slice %126 {offsets = [0, 32], sizes = [2, 32], strides = [1, 1]} : vector<2x96xf32> to vector<2x32xf32>
    %137 = arith.addf %135, %136 : vector<2x32xf32>
    %138 = arith.negf %137 : vector<2x32xf32>
    %139 = math.exp %138 : vector<2x32xf32>
    %cst_29 = arith.constant 1.000000e+00 : f32
    %140 = vector.broadcast %cst_29 : f32 to vector<2x32xf32>
    %141 = arith.addf %140, %139 : vector<2x32xf32>
    %142 = arith.divf %140, %141 : vector<2x32xf32>
    %143 = vector.extract_strided_slice %90 {offsets = [0, 64], sizes = [2, 32], strides = [1, 1]} : vector<2x96xf32> to vector<2x32xf32>
    %144 = vector.extract_strided_slice %126 {offsets = [0, 64], sizes = [2, 32], strides = [1, 1]} : vector<2x96xf32> to vector<2x32xf32>
    %145 = vector.extract_strided_slice %8 {offsets = [1, 0, 0], sizes = [1, 1, 32], strides = [1, 1, 1]} : vector<2x1x32xf32> to vector<1x1x32xf32>
    %146 = vector.shape_cast %145 : vector<1x1x32xf32> to vector<1x32xf32>
    %147 = vector.broadcast %146 : vector<1x32xf32> to vector<2x32xf32>
    %148 = arith.addf %144, %147 : vector<2x32xf32>
    %149 = arith.mulf %134, %148 : vector<2x32xf32>
    %150 = arith.addf %143, %149 : vector<2x32xf32>
    %151 = math.tanh %150 : vector<2x32xf32>
    %cst_30 = arith.constant 1.000000e+00 : f32
    %152 = vector.broadcast %cst_30 : f32 to vector<2x32xf32>
    %153 = arith.subf %152, %142 : vector<2x32xf32>
    %154 = arith.mulf %153, %151 : vector<2x32xf32>
    %155 = arith.mulf %142, %88 : vector<2x32xf32>
    %156 = arith.addf %154, %155 : vector<2x32xf32>
    %c1_i32 = arith.constant 1 : i32
    %157 = vector.broadcast %c1_i32 : i32 to vector<2x1xi32>
    %158 = arith.cmpi sgt, %0, %157 : vector<2x1xi32>
    %159 = vector.shape_cast %158 : vector<2x1xi1> to vector<2x1xi1>
    %160 = vector.broadcast %159 : vector<2x1xi1> to vector<2x32xi1>
    %161 = arith.select %160, %123, %83 : vector<2x32xi1>, vector<2x32xf32>
    %c6_i32 = arith.constant 6 : i32
    %162 = vector.broadcast %c6_i32 : i32 to vector<2x1xi32>
    %163 = arith.cmpi sgt, %0, %162 : vector<2x1xi32>
    %164 = vector.shape_cast %163 : vector<2x1xi1> to vector<2x1xi1>
    %165 = vector.broadcast %164 : vector<2x1xi1> to vector<2x32xi1>
    %166 = arith.select %165, %156, %88 : vector<2x32xi1>, vector<2x32xf32>
    %167 = vector.extract_strided_slice %6 {offsets = [4, 0], sizes = [2, 96], strides = [1, 1]} : vector<16x192xf32> to vector<2x96xf32>
    %168 = vector.extract_strided_slice %6 {offsets = [10, 96], sizes = [2, 96], strides = [1, 1]} : vector<16x192xf32> to vector<2x96xf32>
    %169 = vector.extract_strided_slice %7 {offsets = [0, 0, 0], sizes = [1, 32, 96], strides = [1, 1, 1]} : vector<2x32x96xf32> to vector<1x32x96xf32>
    %170 = vector.shape_cast %169 : vector<1x32x96xf32> to vector<32x96xf32>
    %cst_31 = arith.constant dense<0.000000e+00> : vector<2x96xf32>
    %171 = tpu.matmul %161, %170, %cst_31 {dimension_numbers = #tpu.dot_dimension_numbers<[1], [0], [0], [1], [0, 0, 1, 1], [], []>} : vector<2x32xf32>, vector<32x96xf32>, vector<2x96xf32> -> vector<2x96xf32>
    %172 = vector.extract_strided_slice %167 {offsets = [0, 0], sizes = [2, 32], strides = [1, 1]} : vector<2x96xf32> to vector<2x32xf32>
    %173 = vector.extract_strided_slice %171 {offsets = [0, 0], sizes = [2, 32], strides = [1, 1]} : vector<2x96xf32> to vector<2x32xf32>
    %174 = arith.addf %172, %173 : vector<2x32xf32>
    %175 = arith.negf %174 : vector<2x32xf32>
    %176 = math.exp %175 : vector<2x32xf32>
    %cst_32 = arith.constant 1.000000e+00 : f32
    %177 = vector.broadcast %cst_32 : f32 to vector<2x32xf32>
    %178 = arith.addf %177, %176 : vector<2x32xf32>
    %179 = arith.divf %177, %178 : vector<2x32xf32>
    %180 = vector.extract_strided_slice %167 {offsets = [0, 32], sizes = [2, 32], strides = [1, 1]} : vector<2x96xf32> to vector<2x32xf32>
    %181 = vector.extract_strided_slice %171 {offsets = [0, 32], sizes = [2, 32], strides = [1, 1]} : vector<2x96xf32> to vector<2x32xf32>
    %182 = arith.addf %180, %181 : vector<2x32xf32>
    %183 = arith.negf %182 : vector<2x32xf32>
    %184 = math.exp %183 : vector<2x32xf32>
    %cst_33 = arith.constant 1.000000e+00 : f32
    %185 = vector.broadcast %cst_33 : f32 to vector<2x32xf32>
    %186 = arith.addf %185, %184 : vector<2x32xf32>
    %187 = arith.divf %185, %186 : vector<2x32xf32>
    %188 = vector.extract_strided_slice %167 {offsets = [0, 64], sizes = [2, 32], strides = [1, 1]} : vector<2x96xf32> to vector<2x32xf32>
    %189 = vector.extract_strided_slice %171 {offsets = [0, 64], sizes = [2, 32], strides = [1, 1]} : vector<2x96xf32> to vector<2x32xf32>
    %190 = vector.extract_strided_slice %8 {offsets = [0, 0, 0], sizes = [1, 1, 32], strides = [1, 1, 1]} : vector<2x1x32xf32> to vector<1x1x32xf32>
    %191 = vector.shape_cast %190 : vector<1x1x32xf32> to vector<1x32xf32>
    %192 = vector.broadcast %191 : vector<1x32xf32> to vector<2x32xf32>
    %193 = arith.addf %189, %192 : vector<2x32xf32>
    %194 = arith.mulf %179, %193 : vector<2x32xf32>
    %195 = arith.addf %188, %194 : vector<2x32xf32>
    %196 = math.tanh %195 : vector<2x32xf32>
    %cst_34 = arith.constant 1.000000e+00 : f32
    %197 = vector.broadcast %cst_34 : f32 to vector<2x32xf32>
    %198 = arith.subf %197, %187 : vector<2x32xf32>
    %199 = arith.mulf %198, %196 : vector<2x32xf32>
    %200 = arith.mulf %187, %161 : vector<2x32xf32>
    %201 = arith.addf %199, %200 : vector<2x32xf32>
    %202 = vector.extract_strided_slice %7 {offsets = [1, 0, 0], sizes = [1, 32, 96], strides = [1, 1, 1]} : vector<2x32x96xf32> to vector<1x32x96xf32>
    %203 = vector.shape_cast %202 : vector<1x32x96xf32> to vector<32x96xf32>
    %cst_35 = arith.constant dense<0.000000e+00> : vector<2x96xf32>
    %204 = tpu.matmul %166, %203, %cst_35 {dimension_numbers = #tpu.dot_dimension_numbers<[1], [0], [0], [1], [0, 0, 1, 1], [], []>} : vector<2x32xf32>, vector<32x96xf32>, vector<2x96xf32> -> vector<2x96xf32>
    %205 = vector.extract_strided_slice %168 {offsets = [0, 0], sizes = [2, 32], strides = [1, 1]} : vector<2x96xf32> to vector<2x32xf32>
    %206 = vector.extract_strided_slice %204 {offsets = [0, 0], sizes = [2, 32], strides = [1, 1]} : vector<2x96xf32> to vector<2x32xf32>
    %207 = arith.addf %205, %206 : vector<2x32xf32>
    %208 = arith.negf %207 : vector<2x32xf32>
    %209 = math.exp %208 : vector<2x32xf32>
    %cst_36 = arith.constant 1.000000e+00 : f32
    %210 = vector.broadcast %cst_36 : f32 to vector<2x32xf32>
    %211 = arith.addf %210, %209 : vector<2x32xf32>
    %212 = arith.divf %210, %211 : vector<2x32xf32>
    %213 = vector.extract_strided_slice %168 {offsets = [0, 32], sizes = [2, 32], strides = [1, 1]} : vector<2x96xf32> to vector<2x32xf32>
    %214 = vector.extract_strided_slice %204 {offsets = [0, 32], sizes = [2, 32], strides = [1, 1]} : vector<2x96xf32> to vector<2x32xf32>
    %215 = arith.addf %213, %214 : vector<2x32xf32>
    %216 = arith.negf %215 : vector<2x32xf32>
    %217 = math.exp %216 : vector<2x32xf32>
    %cst_37 = arith.constant 1.000000e+00 : f32
    %218 = vector.broadcast %cst_37 : f32 to vector<2x32xf32>
    %219 = arith.addf %218, %217 : vector<2x32xf32>
    %220 = arith.divf %218, %219 : vector<2x32xf32>
    %221 = vector.extract_strided_slice %168 {offsets = [0, 64], sizes = [2, 32], strides = [1, 1]} : vector<2x96xf32> to vector<2x32xf32>
    %222 = vector.extract_strided_slice %204 {offsets = [0, 64], sizes = [2, 32], strides = [1, 1]} : vector<2x96xf32> to vector<2x32xf32>
    %223 = vector.extract_strided_slice %8 {offsets = [1, 0, 0], sizes = [1, 1, 32], strides = [1, 1, 1]} : vector<2x1x32xf32> to vector<1x1x32xf32>
    %224 = vector.shape_cast %223 : vector<1x1x32xf32> to vector<1x32xf32>
    %225 = vector.broadcast %224 : vector<1x32xf32> to vector<2x32xf32>
    %226 = arith.addf %222, %225 : vector<2x32xf32>
    %227 = arith.mulf %212, %226 : vector<2x32xf32>
    %228 = arith.addf %221, %227 : vector<2x32xf32>
    %229 = math.tanh %228 : vector<2x32xf32>
    %cst_38 = arith.constant 1.000000e+00 : f32
    %230 = vector.broadcast %cst_38 : f32 to vector<2x32xf32>
    %231 = arith.subf %230, %220 : vector<2x32xf32>
    %232 = arith.mulf %231, %229 : vector<2x32xf32>
    %233 = arith.mulf %220, %166 : vector<2x32xf32>
    %234 = arith.addf %232, %233 : vector<2x32xf32>
    %c2_i32 = arith.constant 2 : i32
    %235 = vector.broadcast %c2_i32 : i32 to vector<2x1xi32>
    %236 = arith.cmpi sgt, %0, %235 : vector<2x1xi32>
    %237 = vector.shape_cast %236 : vector<2x1xi1> to vector<2x1xi1>
    %238 = vector.broadcast %237 : vector<2x1xi1> to vector<2x32xi1>
    %239 = arith.select %238, %201, %161 : vector<2x32xi1>, vector<2x32xf32>
    %c5_i32 = arith.constant 5 : i32
    %240 = vector.broadcast %c5_i32 : i32 to vector<2x1xi32>
    %241 = arith.cmpi sgt, %0, %240 : vector<2x1xi32>
    %242 = vector.shape_cast %241 : vector<2x1xi1> to vector<2x1xi1>
    %243 = vector.broadcast %242 : vector<2x1xi1> to vector<2x32xi1>
    %244 = arith.select %243, %234, %166 : vector<2x32xi1>, vector<2x32xf32>
    %245 = vector.extract_strided_slice %6 {offsets = [6, 0], sizes = [2, 96], strides = [1, 1]} : vector<16x192xf32> to vector<2x96xf32>
    %246 = vector.extract_strided_slice %6 {offsets = [8, 96], sizes = [2, 96], strides = [1, 1]} : vector<16x192xf32> to vector<2x96xf32>
    %247 = vector.extract_strided_slice %7 {offsets = [0, 0, 0], sizes = [1, 32, 96], strides = [1, 1, 1]} : vector<2x32x96xf32> to vector<1x32x96xf32>
    %248 = vector.shape_cast %247 : vector<1x32x96xf32> to vector<32x96xf32>
    %cst_39 = arith.constant dense<0.000000e+00> : vector<2x96xf32>
    %249 = tpu.matmul %239, %248, %cst_39 {dimension_numbers = #tpu.dot_dimension_numbers<[1], [0], [0], [1], [0, 0, 1, 1], [], []>} : vector<2x32xf32>, vector<32x96xf32>, vector<2x96xf32> -> vector<2x96xf32>
    %250 = vector.extract_strided_slice %245 {offsets = [0, 0], sizes = [2, 32], strides = [1, 1]} : vector<2x96xf32> to vector<2x32xf32>
    %251 = vector.extract_strided_slice %249 {offsets = [0, 0], sizes = [2, 32], strides = [1, 1]} : vector<2x96xf32> to vector<2x32xf32>
    %252 = arith.addf %250, %251 : vector<2x32xf32>
    %253 = arith.negf %252 : vector<2x32xf32>
    %254 = math.exp %253 : vector<2x32xf32>
    %cst_40 = arith.constant 1.000000e+00 : f32
    %255 = vector.broadcast %cst_40 : f32 to vector<2x32xf32>
    %256 = arith.addf %255, %254 : vector<2x32xf32>
    %257 = arith.divf %255, %256 : vector<2x32xf32>
    %258 = vector.extract_strided_slice %245 {offsets = [0, 32], sizes = [2, 32], strides = [1, 1]} : vector<2x96xf32> to vector<2x32xf32>
    %259 = vector.extract_strided_slice %249 {offsets = [0, 32], sizes = [2, 32], strides = [1, 1]} : vector<2x96xf32> to vector<2x32xf32>
    %260 = arith.addf %258, %259 : vector<2x32xf32>
    %261 = arith.negf %260 : vector<2x32xf32>
    %262 = math.exp %261 : vector<2x32xf32>
    %cst_41 = arith.constant 1.000000e+00 : f32
    %263 = vector.broadcast %cst_41 : f32 to vector<2x32xf32>
    %264 = arith.addf %263, %262 : vector<2x32xf32>
    %265 = arith.divf %263, %264 : vector<2x32xf32>
    %266 = vector.extract_strided_slice %245 {offsets = [0, 64], sizes = [2, 32], strides = [1, 1]} : vector<2x96xf32> to vector<2x32xf32>
    %267 = vector.extract_strided_slice %249 {offsets = [0, 64], sizes = [2, 32], strides = [1, 1]} : vector<2x96xf32> to vector<2x32xf32>
    %268 = vector.extract_strided_slice %8 {offsets = [0, 0, 0], sizes = [1, 1, 32], strides = [1, 1, 1]} : vector<2x1x32xf32> to vector<1x1x32xf32>
    %269 = vector.shape_cast %268 : vector<1x1x32xf32> to vector<1x32xf32>
    %270 = vector.broadcast %269 : vector<1x32xf32> to vector<2x32xf32>
    %271 = arith.addf %267, %270 : vector<2x32xf32>
    %272 = arith.mulf %257, %271 : vector<2x32xf32>
    %273 = arith.addf %266, %272 : vector<2x32xf32>
    %274 = math.tanh %273 : vector<2x32xf32>
    %cst_42 = arith.constant 1.000000e+00 : f32
    %275 = vector.broadcast %cst_42 : f32 to vector<2x32xf32>
    %276 = arith.subf %275, %265 : vector<2x32xf32>
    %277 = arith.mulf %276, %274 : vector<2x32xf32>
    %278 = arith.mulf %265, %239 : vector<2x32xf32>
    %279 = arith.addf %277, %278 : vector<2x32xf32>
    %280 = vector.extract_strided_slice %7 {offsets = [1, 0, 0], sizes = [1, 32, 96], strides = [1, 1, 1]} : vector<2x32x96xf32> to vector<1x32x96xf32>
    %281 = vector.shape_cast %280 : vector<1x32x96xf32> to vector<32x96xf32>
    %cst_43 = arith.constant dense<0.000000e+00> : vector<2x96xf32>
    %282 = tpu.matmul %244, %281, %cst_43 {dimension_numbers = #tpu.dot_dimension_numbers<[1], [0], [0], [1], [0, 0, 1, 1], [], []>} : vector<2x32xf32>, vector<32x96xf32>, vector<2x96xf32> -> vector<2x96xf32>
    %283 = vector.extract_strided_slice %246 {offsets = [0, 0], sizes = [2, 32], strides = [1, 1]} : vector<2x96xf32> to vector<2x32xf32>
    %284 = vector.extract_strided_slice %282 {offsets = [0, 0], sizes = [2, 32], strides = [1, 1]} : vector<2x96xf32> to vector<2x32xf32>
    %285 = arith.addf %283, %284 : vector<2x32xf32>
    %286 = arith.negf %285 : vector<2x32xf32>
    %287 = math.exp %286 : vector<2x32xf32>
    %cst_44 = arith.constant 1.000000e+00 : f32
    %288 = vector.broadcast %cst_44 : f32 to vector<2x32xf32>
    %289 = arith.addf %288, %287 : vector<2x32xf32>
    %290 = arith.divf %288, %289 : vector<2x32xf32>
    %291 = vector.extract_strided_slice %246 {offsets = [0, 32], sizes = [2, 32], strides = [1, 1]} : vector<2x96xf32> to vector<2x32xf32>
    %292 = vector.extract_strided_slice %282 {offsets = [0, 32], sizes = [2, 32], strides = [1, 1]} : vector<2x96xf32> to vector<2x32xf32>
    %293 = arith.addf %291, %292 : vector<2x32xf32>
    %294 = arith.negf %293 : vector<2x32xf32>
    %295 = math.exp %294 : vector<2x32xf32>
    %cst_45 = arith.constant 1.000000e+00 : f32
    %296 = vector.broadcast %cst_45 : f32 to vector<2x32xf32>
    %297 = arith.addf %296, %295 : vector<2x32xf32>
    %298 = arith.divf %296, %297 : vector<2x32xf32>
    %299 = vector.extract_strided_slice %246 {offsets = [0, 64], sizes = [2, 32], strides = [1, 1]} : vector<2x96xf32> to vector<2x32xf32>
    %300 = vector.extract_strided_slice %282 {offsets = [0, 64], sizes = [2, 32], strides = [1, 1]} : vector<2x96xf32> to vector<2x32xf32>
    %301 = vector.extract_strided_slice %8 {offsets = [1, 0, 0], sizes = [1, 1, 32], strides = [1, 1, 1]} : vector<2x1x32xf32> to vector<1x1x32xf32>
    %302 = vector.shape_cast %301 : vector<1x1x32xf32> to vector<1x32xf32>
    %303 = vector.broadcast %302 : vector<1x32xf32> to vector<2x32xf32>
    %304 = arith.addf %300, %303 : vector<2x32xf32>
    %305 = arith.mulf %290, %304 : vector<2x32xf32>
    %306 = arith.addf %299, %305 : vector<2x32xf32>
    %307 = math.tanh %306 : vector<2x32xf32>
    %cst_46 = arith.constant 1.000000e+00 : f32
    %308 = vector.broadcast %cst_46 : f32 to vector<2x32xf32>
    %309 = arith.subf %308, %298 : vector<2x32xf32>
    %310 = arith.mulf %309, %307 : vector<2x32xf32>
    %311 = arith.mulf %298, %244 : vector<2x32xf32>
    %312 = arith.addf %310, %311 : vector<2x32xf32>
    %c3_i32 = arith.constant 3 : i32
    %313 = vector.broadcast %c3_i32 : i32 to vector<2x1xi32>
    %314 = arith.cmpi sgt, %0, %313 : vector<2x1xi32>
    %315 = vector.shape_cast %314 : vector<2x1xi1> to vector<2x1xi1>
    %316 = vector.broadcast %315 : vector<2x1xi1> to vector<2x32xi1>
    %317 = arith.select %316, %279, %239 : vector<2x32xi1>, vector<2x32xf32>
    %c4_i32 = arith.constant 4 : i32
    %318 = vector.broadcast %c4_i32 : i32 to vector<2x1xi32>
    %319 = arith.cmpi sgt, %0, %318 : vector<2x1xi32>
    %320 = vector.shape_cast %319 : vector<2x1xi1> to vector<2x1xi1>
    %321 = vector.broadcast %320 : vector<2x1xi1> to vector<2x32xi1>
    %322 = arith.select %321, %312, %244 : vector<2x32xi1>, vector<2x32xf32>
    %323 = vector.extract_strided_slice %6 {offsets = [8, 0], sizes = [2, 96], strides = [1, 1]} : vector<16x192xf32> to vector<2x96xf32>
    %324 = vector.extract_strided_slice %6 {offsets = [6, 96], sizes = [2, 96], strides = [1, 1]} : vector<16x192xf32> to vector<2x96xf32>
    %325 = vector.extract_strided_slice %7 {offsets = [0, 0, 0], sizes = [1, 32, 96], strides = [1, 1, 1]} : vector<2x32x96xf32> to vector<1x32x96xf32>
    %326 = vector.shape_cast %325 : vector<1x32x96xf32> to vector<32x96xf32>
    %cst_47 = arith.constant dense<0.000000e+00> : vector<2x96xf32>
    %327 = tpu.matmul %317, %326, %cst_47 {dimension_numbers = #tpu.dot_dimension_numbers<[1], [0], [0], [1], [0, 0, 1, 1], [], []>} : vector<2x32xf32>, vector<32x96xf32>, vector<2x96xf32> -> vector<2x96xf32>
    %328 = vector.extract_strided_slice %323 {offsets = [0, 0], sizes = [2, 32], strides = [1, 1]} : vector<2x96xf32> to vector<2x32xf32>
    %329 = vector.extract_strided_slice %327 {offsets = [0, 0], sizes = [2, 32], strides = [1, 1]} : vector<2x96xf32> to vector<2x32xf32>
    %330 = arith.addf %328, %329 : vector<2x32xf32>
    %331 = arith.negf %330 : vector<2x32xf32>
    %332 = math.exp %331 : vector<2x32xf32>
    %cst_48 = arith.constant 1.000000e+00 : f32
    %333 = vector.broadcast %cst_48 : f32 to vector<2x32xf32>
    %334 = arith.addf %333, %332 : vector<2x32xf32>
    %335 = arith.divf %333, %334 : vector<2x32xf32>
    %336 = vector.extract_strided_slice %323 {offsets = [0, 32], sizes = [2, 32], strides = [1, 1]} : vector<2x96xf32> to vector<2x32xf32>
    %337 = vector.extract_strided_slice %327 {offsets = [0, 32], sizes = [2, 32], strides = [1, 1]} : vector<2x96xf32> to vector<2x32xf32>
    %338 = arith.addf %336, %337 : vector<2x32xf32>
    %339 = arith.negf %338 : vector<2x32xf32>
    %340 = math.exp %339 : vector<2x32xf32>
    %cst_49 = arith.constant 1.000000e+00 : f32
    %341 = vector.broadcast %cst_49 : f32 to vector<2x32xf32>
    %342 = arith.addf %341, %340 : vector<2x32xf32>
    %343 = arith.divf %341, %342 : vector<2x32xf32>
    %344 = vector.extract_strided_slice %323 {offsets = [0, 64], sizes = [2, 32], strides = [1, 1]} : vector<2x96xf32> to vector<2x32xf32>
    %345 = vector.extract_strided_slice %327 {offsets = [0, 64], sizes = [2, 32], strides = [1, 1]} : vector<2x96xf32> to vector<2x32xf32>
    %346 = vector.extract_strided_slice %8 {offsets = [0, 0, 0], sizes = [1, 1, 32], strides = [1, 1, 1]} : vector<2x1x32xf32> to vector<1x1x32xf32>
    %347 = vector.shape_cast %346 : vector<1x1x32xf32> to vector<1x32xf32>
    %348 = vector.broadcast %347 : vector<1x32xf32> to vector<2x32xf32>
    %349 = arith.addf %345, %348 : vector<2x32xf32>
    %350 = arith.mulf %335, %349 : vector<2x32xf32>
    %351 = arith.addf %344, %350 : vector<2x32xf32>
    %352 = math.tanh %351 : vector<2x32xf32>
    %cst_50 = arith.constant 1.000000e+00 : f32
    %353 = vector.broadcast %cst_50 : f32 to vector<2x32xf32>
    %354 = arith.subf %353, %343 : vector<2x32xf32>
    %355 = arith.mulf %354, %352 : vector<2x32xf32>
    %356 = arith.mulf %343, %317 : vector<2x32xf32>
    %357 = arith.addf %355, %356 : vector<2x32xf32>
    %358 = vector.extract_strided_slice %7 {offsets = [1, 0, 0], sizes = [1, 32, 96], strides = [1, 1, 1]} : vector<2x32x96xf32> to vector<1x32x96xf32>
    %359 = vector.shape_cast %358 : vector<1x32x96xf32> to vector<32x96xf32>
    %cst_51 = arith.constant dense<0.000000e+00> : vector<2x96xf32>
    %360 = tpu.matmul %322, %359, %cst_51 {dimension_numbers = #tpu.dot_dimension_numbers<[1], [0], [0], [1], [0, 0, 1, 1], [], []>} : vector<2x32xf32>, vector<32x96xf32>, vector<2x96xf32> -> vector<2x96xf32>
    %361 = vector.extract_strided_slice %324 {offsets = [0, 0], sizes = [2, 32], strides = [1, 1]} : vector<2x96xf32> to vector<2x32xf32>
    %362 = vector.extract_strided_slice %360 {offsets = [0, 0], sizes = [2, 32], strides = [1, 1]} : vector<2x96xf32> to vector<2x32xf32>
    %363 = arith.addf %361, %362 : vector<2x32xf32>
    %364 = arith.negf %363 : vector<2x32xf32>
    %365 = math.exp %364 : vector<2x32xf32>
    %cst_52 = arith.constant 1.000000e+00 : f32
    %366 = vector.broadcast %cst_52 : f32 to vector<2x32xf32>
    %367 = arith.addf %366, %365 : vector<2x32xf32>
    %368 = arith.divf %366, %367 : vector<2x32xf32>
    %369 = vector.extract_strided_slice %324 {offsets = [0, 32], sizes = [2, 32], strides = [1, 1]} : vector<2x96xf32> to vector<2x32xf32>
    %370 = vector.extract_strided_slice %360 {offsets = [0, 32], sizes = [2, 32], strides = [1, 1]} : vector<2x96xf32> to vector<2x32xf32>
    %371 = arith.addf %369, %370 : vector<2x32xf32>
    %372 = arith.negf %371 : vector<2x32xf32>
    %373 = math.exp %372 : vector<2x32xf32>
    %cst_53 = arith.constant 1.000000e+00 : f32
    %374 = vector.broadcast %cst_53 : f32 to vector<2x32xf32>
    %375 = arith.addf %374, %373 : vector<2x32xf32>
    %376 = arith.divf %374, %375 : vector<2x32xf32>
    %377 = vector.extract_strided_slice %324 {offsets = [0, 64], sizes = [2, 32], strides = [1, 1]} : vector<2x96xf32> to vector<2x32xf32>
    %378 = vector.extract_strided_slice %360 {offsets = [0, 64], sizes = [2, 32], strides = [1, 1]} : vector<2x96xf32> to vector<2x32xf32>
    %379 = vector.extract_strided_slice %8 {offsets = [1, 0, 0], sizes = [1, 1, 32], strides = [1, 1, 1]} : vector<2x1x32xf32> to vector<1x1x32xf32>
    %380 = vector.shape_cast %379 : vector<1x1x32xf32> to vector<1x32xf32>
    %381 = vector.broadcast %380 : vector<1x32xf32> to vector<2x32xf32>
    %382 = arith.addf %378, %381 : vector<2x32xf32>
    %383 = arith.mulf %368, %382 : vector<2x32xf32>
    %384 = arith.addf %377, %383 : vector<2x32xf32>
    %385 = math.tanh %384 : vector<2x32xf32>
    %cst_54 = arith.constant 1.000000e+00 : f32
    %386 = vector.broadcast %cst_54 : f32 to vector<2x32xf32>
    %387 = arith.subf %386, %376 : vector<2x32xf32>
    %388 = arith.mulf %387, %385 : vector<2x32xf32>
    %389 = arith.mulf %376, %322 : vector<2x32xf32>
    %390 = arith.addf %388, %389 : vector<2x32xf32>
    %c4_i32_55 = arith.constant 4 : i32
    %391 = vector.broadcast %c4_i32_55 : i32 to vector<2x1xi32>
    %392 = arith.cmpi sgt, %0, %391 : vector<2x1xi32>
    %393 = vector.shape_cast %392 : vector<2x1xi1> to vector<2x1xi1>
    %394 = vector.broadcast %393 : vector<2x1xi1> to vector<2x32xi1>
    %395 = arith.select %394, %357, %317 : vector<2x32xi1>, vector<2x32xf32>
    %c3_i32_56 = arith.constant 3 : i32
    %396 = vector.broadcast %c3_i32_56 : i32 to vector<2x1xi32>
    %397 = arith.cmpi sgt, %0, %396 : vector<2x1xi32>
    %398 = vector.shape_cast %397 : vector<2x1xi1> to vector<2x1xi1>
    %399 = vector.broadcast %398 : vector<2x1xi1> to vector<2x32xi1>
    %400 = arith.select %399, %390, %322 : vector<2x32xi1>, vector<2x32xf32>
    %401 = vector.extract_strided_slice %6 {offsets = [10, 0], sizes = [2, 96], strides = [1, 1]} : vector<16x192xf32> to vector<2x96xf32>
    %402 = vector.extract_strided_slice %6 {offsets = [4, 96], sizes = [2, 96], strides = [1, 1]} : vector<16x192xf32> to vector<2x96xf32>
    %403 = vector.extract_strided_slice %7 {offsets = [0, 0, 0], sizes = [1, 32, 96], strides = [1, 1, 1]} : vector<2x32x96xf32> to vector<1x32x96xf32>
    %404 = vector.shape_cast %403 : vector<1x32x96xf32> to vector<32x96xf32>
    %cst_57 = arith.constant dense<0.000000e+00> : vector<2x96xf32>
    %405 = tpu.matmul %395, %404, %cst_57 {dimension_numbers = #tpu.dot_dimension_numbers<[1], [0], [0], [1], [0, 0, 1, 1], [], []>} : vector<2x32xf32>, vector<32x96xf32>, vector<2x96xf32> -> vector<2x96xf32>
    %406 = vector.extract_strided_slice %401 {offsets = [0, 0], sizes = [2, 32], strides = [1, 1]} : vector<2x96xf32> to vector<2x32xf32>
    %407 = vector.extract_strided_slice %405 {offsets = [0, 0], sizes = [2, 32], strides = [1, 1]} : vector<2x96xf32> to vector<2x32xf32>
    %408 = arith.addf %406, %407 : vector<2x32xf32>
    %409 = arith.negf %408 : vector<2x32xf32>
    %410 = math.exp %409 : vector<2x32xf32>
    %cst_58 = arith.constant 1.000000e+00 : f32
    %411 = vector.broadcast %cst_58 : f32 to vector<2x32xf32>
    %412 = arith.addf %411, %410 : vector<2x32xf32>
    %413 = arith.divf %411, %412 : vector<2x32xf32>
    %414 = vector.extract_strided_slice %401 {offsets = [0, 32], sizes = [2, 32], strides = [1, 1]} : vector<2x96xf32> to vector<2x32xf32>
    %415 = vector.extract_strided_slice %405 {offsets = [0, 32], sizes = [2, 32], strides = [1, 1]} : vector<2x96xf32> to vector<2x32xf32>
    %416 = arith.addf %414, %415 : vector<2x32xf32>
    %417 = arith.negf %416 : vector<2x32xf32>
    %418 = math.exp %417 : vector<2x32xf32>
    %cst_59 = arith.constant 1.000000e+00 : f32
    %419 = vector.broadcast %cst_59 : f32 to vector<2x32xf32>
    %420 = arith.addf %419, %418 : vector<2x32xf32>
    %421 = arith.divf %419, %420 : vector<2x32xf32>
    %422 = vector.extract_strided_slice %401 {offsets = [0, 64], sizes = [2, 32], strides = [1, 1]} : vector<2x96xf32> to vector<2x32xf32>
    %423 = vector.extract_strided_slice %405 {offsets = [0, 64], sizes = [2, 32], strides = [1, 1]} : vector<2x96xf32> to vector<2x32xf32>
    %424 = vector.extract_strided_slice %8 {offsets = [0, 0, 0], sizes = [1, 1, 32], strides = [1, 1, 1]} : vector<2x1x32xf32> to vector<1x1x32xf32>
    %425 = vector.shape_cast %424 : vector<1x1x32xf32> to vector<1x32xf32>
    %426 = vector.broadcast %425 : vector<1x32xf32> to vector<2x32xf32>
    %427 = arith.addf %423, %426 : vector<2x32xf32>
    %428 = arith.mulf %413, %427 : vector<2x32xf32>
    %429 = arith.addf %422, %428 : vector<2x32xf32>
    %430 = math.tanh %429 : vector<2x32xf32>
    %cst_60 = arith.constant 1.000000e+00 : f32
    %431 = vector.broadcast %cst_60 : f32 to vector<2x32xf32>
    %432 = arith.subf %431, %421 : vector<2x32xf32>
    %433 = arith.mulf %432, %430 : vector<2x32xf32>
    %434 = arith.mulf %421, %395 : vector<2x32xf32>
    %435 = arith.addf %433, %434 : vector<2x32xf32>
    %436 = vector.extract_strided_slice %7 {offsets = [1, 0, 0], sizes = [1, 32, 96], strides = [1, 1, 1]} : vector<2x32x96xf32> to vector<1x32x96xf32>
    %437 = vector.shape_cast %436 : vector<1x32x96xf32> to vector<32x96xf32>
    %cst_61 = arith.constant dense<0.000000e+00> : vector<2x96xf32>
    %438 = tpu.matmul %400, %437, %cst_61 {dimension_numbers = #tpu.dot_dimension_numbers<[1], [0], [0], [1], [0, 0, 1, 1], [], []>} : vector<2x32xf32>, vector<32x96xf32>, vector<2x96xf32> -> vector<2x96xf32>
    %439 = vector.extract_strided_slice %402 {offsets = [0, 0], sizes = [2, 32], strides = [1, 1]} : vector<2x96xf32> to vector<2x32xf32>
    %440 = vector.extract_strided_slice %438 {offsets = [0, 0], sizes = [2, 32], strides = [1, 1]} : vector<2x96xf32> to vector<2x32xf32>
    %441 = arith.addf %439, %440 : vector<2x32xf32>
    %442 = arith.negf %441 : vector<2x32xf32>
    %443 = math.exp %442 : vector<2x32xf32>
    %cst_62 = arith.constant 1.000000e+00 : f32
    %444 = vector.broadcast %cst_62 : f32 to vector<2x32xf32>
    %445 = arith.addf %444, %443 : vector<2x32xf32>
    %446 = arith.divf %444, %445 : vector<2x32xf32>
    %447 = vector.extract_strided_slice %402 {offsets = [0, 32], sizes = [2, 32], strides = [1, 1]} : vector<2x96xf32> to vector<2x32xf32>
    %448 = vector.extract_strided_slice %438 {offsets = [0, 32], sizes = [2, 32], strides = [1, 1]} : vector<2x96xf32> to vector<2x32xf32>
    %449 = arith.addf %447, %448 : vector<2x32xf32>
    %450 = arith.negf %449 : vector<2x32xf32>
    %451 = math.exp %450 : vector<2x32xf32>
    %cst_63 = arith.constant 1.000000e+00 : f32
    %452 = vector.broadcast %cst_63 : f32 to vector<2x32xf32>
    %453 = arith.addf %452, %451 : vector<2x32xf32>
    %454 = arith.divf %452, %453 : vector<2x32xf32>
    %455 = vector.extract_strided_slice %402 {offsets = [0, 64], sizes = [2, 32], strides = [1, 1]} : vector<2x96xf32> to vector<2x32xf32>
    %456 = vector.extract_strided_slice %438 {offsets = [0, 64], sizes = [2, 32], strides = [1, 1]} : vector<2x96xf32> to vector<2x32xf32>
    %457 = vector.extract_strided_slice %8 {offsets = [1, 0, 0], sizes = [1, 1, 32], strides = [1, 1, 1]} : vector<2x1x32xf32> to vector<1x1x32xf32>
    %458 = vector.shape_cast %457 : vector<1x1x32xf32> to vector<1x32xf32>
    %459 = vector.broadcast %458 : vector<1x32xf32> to vector<2x32xf32>
    %460 = arith.addf %456, %459 : vector<2x32xf32>
    %461 = arith.mulf %446, %460 : vector<2x32xf32>
    %462 = arith.addf %455, %461 : vector<2x32xf32>
    %463 = math.tanh %462 : vector<2x32xf32>
    %cst_64 = arith.constant 1.000000e+00 : f32
    %464 = vector.broadcast %cst_64 : f32 to vector<2x32xf32>
    %465 = arith.subf %464, %454 : vector<2x32xf32>
    %466 = arith.mulf %465, %463 : vector<2x32xf32>
    %467 = arith.mulf %454, %400 : vector<2x32xf32>
    %468 = arith.addf %466, %467 : vector<2x32xf32>
    %c5_i32_65 = arith.constant 5 : i32
    %469 = vector.broadcast %c5_i32_65 : i32 to vector<2x1xi32>
    %470 = arith.cmpi sgt, %0, %469 : vector<2x1xi32>
    %471 = vector.shape_cast %470 : vector<2x1xi1> to vector<2x1xi1>
    %472 = vector.broadcast %471 : vector<2x1xi1> to vector<2x32xi1>
    %473 = arith.select %472, %435, %395 : vector<2x32xi1>, vector<2x32xf32>
    %c2_i32_66 = arith.constant 2 : i32
    %474 = vector.broadcast %c2_i32_66 : i32 to vector<2x1xi32>
    %475 = arith.cmpi sgt, %0, %474 : vector<2x1xi32>
    %476 = vector.shape_cast %475 : vector<2x1xi1> to vector<2x1xi1>
    %477 = vector.broadcast %476 : vector<2x1xi1> to vector<2x32xi1>
    %478 = arith.select %477, %468, %400 : vector<2x32xi1>, vector<2x32xf32>
    %479 = vector.extract_strided_slice %6 {offsets = [12, 0], sizes = [2, 96], strides = [1, 1]} : vector<16x192xf32> to vector<2x96xf32>
    %480 = vector.extract_strided_slice %6 {offsets = [2, 96], sizes = [2, 96], strides = [1, 1]} : vector<16x192xf32> to vector<2x96xf32>
    %481 = vector.extract_strided_slice %7 {offsets = [0, 0, 0], sizes = [1, 32, 96], strides = [1, 1, 1]} : vector<2x32x96xf32> to vector<1x32x96xf32>
    %482 = vector.shape_cast %481 : vector<1x32x96xf32> to vector<32x96xf32>
    %cst_67 = arith.constant dense<0.000000e+00> : vector<2x96xf32>
    %483 = tpu.matmul %473, %482, %cst_67 {dimension_numbers = #tpu.dot_dimension_numbers<[1], [0], [0], [1], [0, 0, 1, 1], [], []>} : vector<2x32xf32>, vector<32x96xf32>, vector<2x96xf32> -> vector<2x96xf32>
    %484 = vector.extract_strided_slice %479 {offsets = [0, 0], sizes = [2, 32], strides = [1, 1]} : vector<2x96xf32> to vector<2x32xf32>
    %485 = vector.extract_strided_slice %483 {offsets = [0, 0], sizes = [2, 32], strides = [1, 1]} : vector<2x96xf32> to vector<2x32xf32>
    %486 = arith.addf %484, %485 : vector<2x32xf32>
    %487 = arith.negf %486 : vector<2x32xf32>
    %488 = math.exp %487 : vector<2x32xf32>
    %cst_68 = arith.constant 1.000000e+00 : f32
    %489 = vector.broadcast %cst_68 : f32 to vector<2x32xf32>
    %490 = arith.addf %489, %488 : vector<2x32xf32>
    %491 = arith.divf %489, %490 : vector<2x32xf32>
    %492 = vector.extract_strided_slice %479 {offsets = [0, 32], sizes = [2, 32], strides = [1, 1]} : vector<2x96xf32> to vector<2x32xf32>
    %493 = vector.extract_strided_slice %483 {offsets = [0, 32], sizes = [2, 32], strides = [1, 1]} : vector<2x96xf32> to vector<2x32xf32>
    %494 = arith.addf %492, %493 : vector<2x32xf32>
    %495 = arith.negf %494 : vector<2x32xf32>
    %496 = math.exp %495 : vector<2x32xf32>
    %cst_69 = arith.constant 1.000000e+00 : f32
    %497 = vector.broadcast %cst_69 : f32 to vector<2x32xf32>
    %498 = arith.addf %497, %496 : vector<2x32xf32>
    %499 = arith.divf %497, %498 : vector<2x32xf32>
    %500 = vector.extract_strided_slice %479 {offsets = [0, 64], sizes = [2, 32], strides = [1, 1]} : vector<2x96xf32> to vector<2x32xf32>
    %501 = vector.extract_strided_slice %483 {offsets = [0, 64], sizes = [2, 32], strides = [1, 1]} : vector<2x96xf32> to vector<2x32xf32>
    %502 = vector.extract_strided_slice %8 {offsets = [0, 0, 0], sizes = [1, 1, 32], strides = [1, 1, 1]} : vector<2x1x32xf32> to vector<1x1x32xf32>
    %503 = vector.shape_cast %502 : vector<1x1x32xf32> to vector<1x32xf32>
    %504 = vector.broadcast %503 : vector<1x32xf32> to vector<2x32xf32>
    %505 = arith.addf %501, %504 : vector<2x32xf32>
    %506 = arith.mulf %491, %505 : vector<2x32xf32>
    %507 = arith.addf %500, %506 : vector<2x32xf32>
    %508 = math.tanh %507 : vector<2x32xf32>
    %cst_70 = arith.constant 1.000000e+00 : f32
    %509 = vector.broadcast %cst_70 : f32 to vector<2x32xf32>
    %510 = arith.subf %509, %499 : vector<2x32xf32>
    %511 = arith.mulf %510, %508 : vector<2x32xf32>
    %512 = arith.mulf %499, %473 : vector<2x32xf32>
    %513 = arith.addf %511, %512 : vector<2x32xf32>
    %514 = vector.extract_strided_slice %7 {offsets = [1, 0, 0], sizes = [1, 32, 96], strides = [1, 1, 1]} : vector<2x32x96xf32> to vector<1x32x96xf32>
    %515 = vector.shape_cast %514 : vector<1x32x96xf32> to vector<32x96xf32>
    %cst_71 = arith.constant dense<0.000000e+00> : vector<2x96xf32>
    %516 = tpu.matmul %478, %515, %cst_71 {dimension_numbers = #tpu.dot_dimension_numbers<[1], [0], [0], [1], [0, 0, 1, 1], [], []>} : vector<2x32xf32>, vector<32x96xf32>, vector<2x96xf32> -> vector<2x96xf32>
    %517 = vector.extract_strided_slice %480 {offsets = [0, 0], sizes = [2, 32], strides = [1, 1]} : vector<2x96xf32> to vector<2x32xf32>
    %518 = vector.extract_strided_slice %516 {offsets = [0, 0], sizes = [2, 32], strides = [1, 1]} : vector<2x96xf32> to vector<2x32xf32>
    %519 = arith.addf %517, %518 : vector<2x32xf32>
    %520 = arith.negf %519 : vector<2x32xf32>
    %521 = math.exp %520 : vector<2x32xf32>
    %cst_72 = arith.constant 1.000000e+00 : f32
    %522 = vector.broadcast %cst_72 : f32 to vector<2x32xf32>
    %523 = arith.addf %522, %521 : vector<2x32xf32>
    %524 = arith.divf %522, %523 : vector<2x32xf32>
    %525 = vector.extract_strided_slice %480 {offsets = [0, 32], sizes = [2, 32], strides = [1, 1]} : vector<2x96xf32> to vector<2x32xf32>
    %526 = vector.extract_strided_slice %516 {offsets = [0, 32], sizes = [2, 32], strides = [1, 1]} : vector<2x96xf32> to vector<2x32xf32>
    %527 = arith.addf %525, %526 : vector<2x32xf32>
    %528 = arith.negf %527 : vector<2x32xf32>
    %529 = math.exp %528 : vector<2x32xf32>
    %cst_73 = arith.constant 1.000000e+00 : f32
    %530 = vector.broadcast %cst_73 : f32 to vector<2x32xf32>
    %531 = arith.addf %530, %529 : vector<2x32xf32>
    %532 = arith.divf %530, %531 : vector<2x32xf32>
    %533 = vector.extract_strided_slice %480 {offsets = [0, 64], sizes = [2, 32], strides = [1, 1]} : vector<2x96xf32> to vector<2x32xf32>
    %534 = vector.extract_strided_slice %516 {offsets = [0, 64], sizes = [2, 32], strides = [1, 1]} : vector<2x96xf32> to vector<2x32xf32>
    %535 = vector.extract_strided_slice %8 {offsets = [1, 0, 0], sizes = [1, 1, 32], strides = [1, 1, 1]} : vector<2x1x32xf32> to vector<1x1x32xf32>
    %536 = vector.shape_cast %535 : vector<1x1x32xf32> to vector<1x32xf32>
    %537 = vector.broadcast %536 : vector<1x32xf32> to vector<2x32xf32>
    %538 = arith.addf %534, %537 : vector<2x32xf32>
    %539 = arith.mulf %524, %538 : vector<2x32xf32>
    %540 = arith.addf %533, %539 : vector<2x32xf32>
    %541 = math.tanh %540 : vector<2x32xf32>
    %cst_74 = arith.constant 1.000000e+00 : f32
    %542 = vector.broadcast %cst_74 : f32 to vector<2x32xf32>
    %543 = arith.subf %542, %532 : vector<2x32xf32>
    %544 = arith.mulf %543, %541 : vector<2x32xf32>
    %545 = arith.mulf %532, %478 : vector<2x32xf32>
    %546 = arith.addf %544, %545 : vector<2x32xf32>
    %c6_i32_75 = arith.constant 6 : i32
    %547 = vector.broadcast %c6_i32_75 : i32 to vector<2x1xi32>
    %548 = arith.cmpi sgt, %0, %547 : vector<2x1xi32>
    %549 = vector.shape_cast %548 : vector<2x1xi1> to vector<2x1xi1>
    %550 = vector.broadcast %549 : vector<2x1xi1> to vector<2x32xi1>
    %551 = arith.select %550, %513, %473 : vector<2x32xi1>, vector<2x32xf32>
    %c1_i32_76 = arith.constant 1 : i32
    %552 = vector.broadcast %c1_i32_76 : i32 to vector<2x1xi32>
    %553 = arith.cmpi sgt, %0, %552 : vector<2x1xi32>
    %554 = vector.shape_cast %553 : vector<2x1xi1> to vector<2x1xi1>
    %555 = vector.broadcast %554 : vector<2x1xi1> to vector<2x32xi1>
    %556 = arith.select %555, %546, %478 : vector<2x32xi1>, vector<2x32xf32>
    %557 = vector.extract_strided_slice %6 {offsets = [14, 0], sizes = [2, 96], strides = [1, 1]} : vector<16x192xf32> to vector<2x96xf32>
    %558 = vector.extract_strided_slice %6 {offsets = [0, 96], sizes = [2, 96], strides = [1, 1]} : vector<16x192xf32> to vector<2x96xf32>
    %559 = vector.extract_strided_slice %7 {offsets = [0, 0, 0], sizes = [1, 32, 96], strides = [1, 1, 1]} : vector<2x32x96xf32> to vector<1x32x96xf32>
    %560 = vector.shape_cast %559 : vector<1x32x96xf32> to vector<32x96xf32>
    %cst_77 = arith.constant dense<0.000000e+00> : vector<2x96xf32>
    %561 = tpu.matmul %551, %560, %cst_77 {dimension_numbers = #tpu.dot_dimension_numbers<[1], [0], [0], [1], [0, 0, 1, 1], [], []>} : vector<2x32xf32>, vector<32x96xf32>, vector<2x96xf32> -> vector<2x96xf32>
    %562 = vector.extract_strided_slice %557 {offsets = [0, 0], sizes = [2, 32], strides = [1, 1]} : vector<2x96xf32> to vector<2x32xf32>
    %563 = vector.extract_strided_slice %561 {offsets = [0, 0], sizes = [2, 32], strides = [1, 1]} : vector<2x96xf32> to vector<2x32xf32>
    %564 = arith.addf %562, %563 : vector<2x32xf32>
    %565 = arith.negf %564 : vector<2x32xf32>
    %566 = math.exp %565 : vector<2x32xf32>
    %cst_78 = arith.constant 1.000000e+00 : f32
    %567 = vector.broadcast %cst_78 : f32 to vector<2x32xf32>
    %568 = arith.addf %567, %566 : vector<2x32xf32>
    %569 = arith.divf %567, %568 : vector<2x32xf32>
    %570 = vector.extract_strided_slice %557 {offsets = [0, 32], sizes = [2, 32], strides = [1, 1]} : vector<2x96xf32> to vector<2x32xf32>
    %571 = vector.extract_strided_slice %561 {offsets = [0, 32], sizes = [2, 32], strides = [1, 1]} : vector<2x96xf32> to vector<2x32xf32>
    %572 = arith.addf %570, %571 : vector<2x32xf32>
    %573 = arith.negf %572 : vector<2x32xf32>
    %574 = math.exp %573 : vector<2x32xf32>
    %cst_79 = arith.constant 1.000000e+00 : f32
    %575 = vector.broadcast %cst_79 : f32 to vector<2x32xf32>
    %576 = arith.addf %575, %574 : vector<2x32xf32>
    %577 = arith.divf %575, %576 : vector<2x32xf32>
    %578 = vector.extract_strided_slice %557 {offsets = [0, 64], sizes = [2, 32], strides = [1, 1]} : vector<2x96xf32> to vector<2x32xf32>
    %579 = vector.extract_strided_slice %561 {offsets = [0, 64], sizes = [2, 32], strides = [1, 1]} : vector<2x96xf32> to vector<2x32xf32>
    %580 = vector.extract_strided_slice %8 {offsets = [0, 0, 0], sizes = [1, 1, 32], strides = [1, 1, 1]} : vector<2x1x32xf32> to vector<1x1x32xf32>
    %581 = vector.shape_cast %580 : vector<1x1x32xf32> to vector<1x32xf32>
    %582 = vector.broadcast %581 : vector<1x32xf32> to vector<2x32xf32>
    %583 = arith.addf %579, %582 : vector<2x32xf32>
    %584 = arith.mulf %569, %583 : vector<2x32xf32>
    %585 = arith.addf %578, %584 : vector<2x32xf32>
    %586 = math.tanh %585 : vector<2x32xf32>
    %cst_80 = arith.constant 1.000000e+00 : f32
    %587 = vector.broadcast %cst_80 : f32 to vector<2x32xf32>
    %588 = arith.subf %587, %577 : vector<2x32xf32>
    %589 = arith.mulf %588, %586 : vector<2x32xf32>
    %590 = arith.mulf %577, %551 : vector<2x32xf32>
    %591 = arith.addf %589, %590 : vector<2x32xf32>
    %592 = vector.extract_strided_slice %7 {offsets = [1, 0, 0], sizes = [1, 32, 96], strides = [1, 1, 1]} : vector<2x32x96xf32> to vector<1x32x96xf32>
    %593 = vector.shape_cast %592 : vector<1x32x96xf32> to vector<32x96xf32>
    %cst_81 = arith.constant dense<0.000000e+00> : vector<2x96xf32>
    %594 = tpu.matmul %556, %593, %cst_81 {dimension_numbers = #tpu.dot_dimension_numbers<[1], [0], [0], [1], [0, 0, 1, 1], [], []>} : vector<2x32xf32>, vector<32x96xf32>, vector<2x96xf32> -> vector<2x96xf32>
    %595 = vector.extract_strided_slice %558 {offsets = [0, 0], sizes = [2, 32], strides = [1, 1]} : vector<2x96xf32> to vector<2x32xf32>
    %596 = vector.extract_strided_slice %594 {offsets = [0, 0], sizes = [2, 32], strides = [1, 1]} : vector<2x96xf32> to vector<2x32xf32>
    %597 = arith.addf %595, %596 : vector<2x32xf32>
    %598 = arith.negf %597 : vector<2x32xf32>
    %599 = math.exp %598 : vector<2x32xf32>
    %cst_82 = arith.constant 1.000000e+00 : f32
    %600 = vector.broadcast %cst_82 : f32 to vector<2x32xf32>
    %601 = arith.addf %600, %599 : vector<2x32xf32>
    %602 = arith.divf %600, %601 : vector<2x32xf32>
    %603 = vector.extract_strided_slice %558 {offsets = [0, 32], sizes = [2, 32], strides = [1, 1]} : vector<2x96xf32> to vector<2x32xf32>
    %604 = vector.extract_strided_slice %594 {offsets = [0, 32], sizes = [2, 32], strides = [1, 1]} : vector<2x96xf32> to vector<2x32xf32>
    %605 = arith.addf %603, %604 : vector<2x32xf32>
    %606 = arith.negf %605 : vector<2x32xf32>
    %607 = math.exp %606 : vector<2x32xf32>
    %cst_83 = arith.constant 1.000000e+00 : f32
    %608 = vector.broadcast %cst_83 : f32 to vector<2x32xf32>
    %609 = arith.addf %608, %607 : vector<2x32xf32>
    %610 = arith.divf %608, %609 : vector<2x32xf32>
    %611 = vector.extract_strided_slice %558 {offsets = [0, 64], sizes = [2, 32], strides = [1, 1]} : vector<2x96xf32> to vector<2x32xf32>
    %612 = vector.extract_strided_slice %594 {offsets = [0, 64], sizes = [2, 32], strides = [1, 1]} : vector<2x96xf32> to vector<2x32xf32>
    %613 = vector.extract_strided_slice %8 {offsets = [1, 0, 0], sizes = [1, 1, 32], strides = [1, 1, 1]} : vector<2x1x32xf32> to vector<1x1x32xf32>
    %614 = vector.shape_cast %613 : vector<1x1x32xf32> to vector<1x32xf32>
    %615 = vector.broadcast %614 : vector<1x32xf32> to vector<2x32xf32>
    %616 = arith.addf %612, %615 : vector<2x32xf32>
    %617 = arith.mulf %602, %616 : vector<2x32xf32>
    %618 = arith.addf %611, %617 : vector<2x32xf32>
    %619 = math.tanh %618 : vector<2x32xf32>
    %cst_84 = arith.constant 1.000000e+00 : f32
    %620 = vector.broadcast %cst_84 : f32 to vector<2x32xf32>
    %621 = arith.subf %620, %610 : vector<2x32xf32>
    %622 = arith.mulf %621, %619 : vector<2x32xf32>
    %623 = arith.mulf %610, %556 : vector<2x32xf32>
    %624 = arith.addf %622, %623 : vector<2x32xf32>
    %c7_i32_85 = arith.constant 7 : i32
    %625 = vector.broadcast %c7_i32_85 : i32 to vector<2x1xi32>
    %626 = arith.cmpi sgt, %0, %625 : vector<2x1xi32>
    %627 = vector.shape_cast %626 : vector<2x1xi1> to vector<2x1xi1>
    %628 = vector.broadcast %627 : vector<2x1xi1> to vector<2x32xi1>
    %629 = arith.select %628, %591, %551 : vector<2x32xi1>, vector<2x32xf32>
    %c0_i32_86 = arith.constant 0 : i32
    %630 = vector.broadcast %c0_i32_86 : i32 to vector<2x1xi32>
    %631 = arith.cmpi sgt, %0, %630 : vector<2x1xi32>
    %632 = vector.shape_cast %631 : vector<2x1xi1> to vector<2x1xi1>
    %633 = vector.broadcast %632 : vector<2x1xi1> to vector<2x32xi1>
    %634 = arith.select %633, %624, %556 : vector<2x32xi1>, vector<2x32xf32>
    %c0_87 = arith.constant 0 : index
    %c0_88 = arith.constant 0 : index
    %c0_89 = arith.constant 0 : index
    %635 = vector.load %arg6[%c0_87, %c0_88, %c0_89] : memref<2x32x128xf32, #tpu.memory_space<vmem>>, vector<1x32x128xf32>
    %636 = vector.shape_cast %635 : vector<1x32x128xf32> to vector<32x128xf32>
    %cst_90 = arith.constant dense<0.000000e+00> : vector<2x128xf32>
    %637 = tpu.matmul %629, %636, %cst_90 {dimension_numbers = #tpu.dot_dimension_numbers<[1], [0], [0], [1], [0, 0, 1, 1], [], []>} : vector<2x32xf32>, vector<32x128xf32>, vector<2x128xf32> -> vector<2x128xf32>
    %c1 = arith.constant 1 : index
    %c0_91 = arith.constant 0 : index
    %c0_92 = arith.constant 0 : index
    %638 = vector.load %arg6[%c1, %c0_91, %c0_92] : memref<2x32x128xf32, #tpu.memory_space<vmem>>, vector<1x32x128xf32>
    %639 = vector.shape_cast %638 : vector<1x32x128xf32> to vector<32x128xf32>
    %cst_93 = arith.constant dense<0.000000e+00> : vector<2x128xf32>
    %640 = tpu.matmul %634, %639, %cst_93 {dimension_numbers = #tpu.dot_dimension_numbers<[1], [0], [0], [1], [0, 0, 1, 1], [], []>} : vector<2x32xf32>, vector<32x128xf32>, vector<2x128xf32> -> vector<2x128xf32>
    %641 = arith.addf %637, %640 : vector<2x128xf32>
    %c0_94 = arith.constant 0 : index
    %c0_95 = arith.constant 0 : index
    %642 = vector.load %arg7[%c0_94, %c0_95] : memref<1x128xf32, #tpu.memory_space<vmem>>, vector<1x128xf32>
    %643 = vector.broadcast %642 : vector<1x128xf32> to vector<2x128xf32>
    %644 = arith.addf %641, %643 : vector<2x128xf32>
    %c0_96 = arith.constant 0 : index
    %c0_97 = arith.constant 0 : index
    %645 = vector.load %arg8[%c0_96, %c0_97] : memref<2x128xf32, #tpu.memory_space<vmem>>, vector<2x128xf32>
    tpu.vector_store %arg8[%c0_96, %c0_97], %644 {strides = array<i32>} : memref<2x128xf32, #tpu.memory_space<vmem>>, vector<2x128xf32>,
    return
  }
}

</mosaic_0001>

<bundles_post_ra>
// kernel: model_forward.1
= control target key start
LH: loop header
LB: loop body
LE: loop exit
PB: predicated region body
PF: predicated region fallthrough
CT: control target
= control target key end

     0   :  { %v2821_v3 = vmov 0.0|0.0   ;;  %v2822_v8 = vmov 0.0   ;;  %vm2823_vm0 = vmmov 0   ;;  %s3397_s0 = inlined_call_operand.vmem [shape: f32[16,16], index: 0, kind: input, shape index: {}]   ;;  %s3398_s1 = inlined_call_operand.vmem [shape: s32[2,1], index: 1, kind: input, shape index: {}]   ;;  %s3399_s2 = inlined_call_operand.vmem [shape: f32[16,192], index: 2, kind: input, shape index: {}]   ;;  %s3400_s3 = inlined_call_operand.vmem [shape: f32[1,192], index: 3, kind: input, shape index: {}]   ;;  %s3401_s4 = inlined_call_operand.vmem [shape: f32[2,32,96], index: 4, kind: input, shape index: {}]   ;;  %s3402_s5 = inlined_call_operand.vmem [shape: f32[2,1,32], index: 5, kind: input, shape index: {}]   ;;  %s3403_s6 = inlined_call_operand.vmem [shape: f32[2,32,128], index: 6, kind: input, shape index: {}]   ;;  %s3404_s7 = inlined_call_operand.vmem [shape: f32[1,128], index: 7, kind: input, shape index: {}]   ;;  %s3405_s8 = inlined_call_operand.hbm [shape: f32[2,128], index: 8, kind: output, shape index: {}]  }
   0x1   :  { %v133_v0 = vld [vmem:[%s3401_s4] sm:$0xff]  ;;  %v134_v1 = vld [vmem:[%s3401_s4 + $0x8] sm:$0xff]  ;;  %2551 = vmatprep.subr.bf16.mxu1 %v2821_v3  ;;  %v36_v5 = vld [vmem:[%s3399_s2 + $0x18] sm:$0xff]  ;;  %120 = vmatprep.mubr.f32.mxu0 %v2822_v8 }
   0x2   :  { %v34_v2 = vld [vmem:[%s3399_s2 + $0x8] sm:$0xff]  ;;  %v2884_v4 = vpack.c.bf16 %v134_v1, %v133_v0  ;;  %v33_v6 = vld [vmem:[%s3399_s2] sm:$0xff]  ;;  %v35_v7 = vld [vmem:[%s3399_s2 + $0x10] sm:$0xff]  ;;  %2357 = vmatprep.mubr.msk.f32.mxu1 %vm2823_vm0, %v2822_v8 }
   0x3   :  { %v2547_v9 = vpack.c.bf16 %v36_v5, %v34_v2  ;;  %v2549_v10 = vpack.c.bf16 %v35_v7, %v33_v6  ;;  %v135_v11 = vld [vmem:[%s3401_s4 + $0x10] sm:$0xff]  ;;  %v136_v12 = vld [vmem:[%s3401_s4 + $0x18] sm:$0xff]  ;;  %v2213_v14 = vld [vmem:[%s3402_s5] ss:$0 sm:$0xff] }
   0x4   :  { %2553 = vmatpush3.bf16.msra.mxu1 %v2884_v4  ;;  %v2905_v13 = vpack.c.bf16 %v136_v12, %v135_v11 }
   0x5   :  { %13 = vsyncpa [#allocation3], 0  ;;  %2548 = vmatprep.subr.bf16.mxu0 %v2547_v9  ;;  %2554 = vmatprep.subr.bf16.mxu1 %v2821_v3  ;;  %v31_v15 = vld [vmem:[%s3397_s0] sm:$0xff]  ;;  %vm49_vm1 = vcmask 130048   ;;  %s2824_s24 = smov 64   ;;  %v138_v17 = vld [vmem:[%s3401_s4 + $0x28] sm:$0xff]  ;;  %v39_v29 = vlaneseq }
   0x6   :  { %2550 = vmatpush1.bf16.msra.mxu0 %v2549_v10  ;;  %229 = vrot.lane.b32.xlu0 %v2213_v14, %s2824_s24  ;;  %v137_v16 = vld [vmem:[%s3401_s4 + $0x20] sm:$0xff]  ;;  %v32_v18 = vld [vmem:[%s3397_s0 + $0x8] sm:$0xff]  ;;  %v139_v20 = vld [vmem:[%s3401_s4 + $0x30] sm:$0xff]  ;;  %v2825_v39 = vmov 0   ;;  %vm143_vm4 = vcmask 261120   ;;  %s2828_s10 = smov [#allocation2]  }
   0x7   :  { %2557 = vmatprep.subr.bf16.mxu0 %v2821_v3  ;;  %v2936_v19 = vpack.c.bf16 %v138_v17, %v137_v16  ;;  %v140_v21 = vld [vmem:[%s3401_s4 + $0x38] sm:$0xff]  ;;  %v2966_v30 = vshrl.u32 %v39_v29, 7  ;;  %v2972_v32 = vld [vmem:[%s3400_s3] sm:$0x3]  ;;  %2667 = vset.pattern.permute.xlu1 %v2825_v39  ;;  %s2202_s11 = sshll.u32 %s2828_s10, 4  ;;  %s2203_s11 = int_to_ptr.vmem [resolvable:$true] %s2202_s11 }
   0x8   :  { %2556 = vmatpush3.bf16.msra.mxu1 %v2905_v13  ;;  %v2948_v22 = vpack.c.bf16 %v140_v21, %v139_v20  ;;  %2668 = vset.pattern.permute.xlu0 %v2825_v39  ;;  %v2983_v40 = vld [vmem:[%s3398_s1] sm:$0x3]  ;;  %s2826_s1 = smov 96   ;;  %s2797_s12 = scalar_lea.vmem %s2203_s11, 32 }
   0x9   :  { %2210 = vmatmul.mubr.msk.f32.vlgmr.msra.gmra.mrb[0].mxu0 %vm49_vm1, %v31_v15  ;;  %2563 = vmatprep.subr.bf16.mxu1 %v2821_v3  ;;  %v41_v31 = vsub.s32 0, %v2966_v30  ;;  %vm370_vm2 = vcmp.gt.s32.totalorder %v2983_v40, 0  ;;  %v2216_v52 = vld [vmem:[%s3402_s5 + $0x1] ss:$0 sm:$0xff]  ;;  %s2827_s5 = smov 32   ;;  %vm377_vm5 = vcmp.gt.s32.totalorder %v2983_v40, 7  ;;  %p2798_p0 = scmp.ne.s32.totalorder %s2203_s11, %s2797_s12 }
   0xa   :  { %126 = vmatprep.mubr.f32.mxu0 %v2822_v8  ;;  %2559 = vmatpush3.bf16.msra.mxu0 %v2936_v19  ;;  %v371_v44 = vsel %vm370_vm2, 1, %v2825_v39  ;;  %v378_v10 = vsel %vm377_vm5, 1, %v2825_v39  ;;  %v45_v15 = vsub.s32 1, %v2966_v30  ;;  %vm610_vm7 = vcmp.gt.s32.totalorder %v2983_v40, 1  ;;  %p2802_p1 = scmp.lt.s32.totalorder %s2203_s11, %s2203_s11  ;;  %p2803_p2 = scmp.lt.s32.totalorder %s2797_s12, %s2797_s12 }
   0xb   :  { %2358 = vmatmul.mubr.f32.vlgmr.msra.gmra.mrb[0].mxu1 %v2822_v8  ;;  %2560 = vmatprep.subr.bf16.mxu0 %v2821_v3  ;;  %v42_v33 = vrot.slane %v2972_v32, %v41_v31  ;;  %vm623_vm8 = vcmp.gt.s32.totalorder %v2983_v40, 6  ;;  %vm856_vm11 = vcmp.gt.s32.totalorder %v2983_v40, 2  ;;  %vm868_vm12 = vcmp.gt.s32.totalorder %v2983_v40, 5 }
   0xc   :  { %2565 = vmatpush3.bf16.msra.mxu1 %v2884_v4  ;;  %2379 = vmatprep.mubr.msk.f32.mxu1 %vm2823_vm0, %v2822_v8  ;;  %v3026_v16 = vrot.slane %v2972_v32, %v45_v15  ;;  %vm1097_vm15 = vcmp.gt.s32.totalorder %v2983_v40, 3  ;;  %p2804_p3 = por %p2803_p2, %p2802_p1 }
   0xd   :  { %2566 = vmatprep.subr.bf16.mxu1 %v2821_v3  ;;  %2211 = vmatmul.mubr.msk.f32.gmra.mrb[2].mxu0 %vm49_vm1, %v32_v18  ;;  %vm1109_vm1 = vcmp.gt.s32.totalorder %v2983_v40, 4 }
   0xe   :  { %2368 = vmatprep.mubr.msk.f32.mxu0 %vm2823_vm0, %v2822_v8  ;;  %2562 = vmatpush3.bf16.msra.mxu0 %v2948_v22  ;;  %p2805_p4 = pnand %p2804_p3, %p2798_p0 }
   0xf   :  { %2569 = vmatprep.subr.bf16.mxu0 %v2821_v3 }
  0x10   :  { %2568 = vmatpush3.bf16.msra.mxu1 %v2905_v13 }
  0x11   :  { %2575 = vmatprep.subr.bf16.mxu1 %v2821_v3  ;;  %2369 = vmatmul.mubr.f32.vlgmr.msra.gmra.mrb[4].mxu0 %v2822_v8 }
  0x12   :  { %2571 = vmatpush3.bf16.msra.mxu0 %v2936_v19  ;;  %2390 = vmatprep.mubr.msk.f32.mxu0 %vm2823_vm0, %v2822_v8 }
  0x13   :  { %2572 = vmatprep.subr.bf16.mxu0 %v2821_v3 }
  0x16   :  { %2574 = vmatpush3.bf16.msra.mxu0 %v2948_v22 }
  0x17   :  { %2581 = vmatprep.subr.bf16.mxu0 %v2821_v3 }
  0x78   :  { %v2951_v24 = vpop.permute.xlu0 %229 }
  0xdc   :  { %v122_v23 = vpop.f32.mrb[0].mxu0 }
  0xdd   :  { %v2953_v25 = vpop.f32.mrb[1].mxu0  ;;  %v2975_v34 = vadd.f32 %v122_v23, %v42_v33 }
  0xde   :  { %v213_v26 = vpop.f32.mrb[0].mxu1 }
  0xdf   :  { %v232_v27 = vadd.f32 %v2951_v24, %v213_v26  ;;  %v2359_v28 = vpop.f32.mrb[1].mxu1  ;;  %v217_v35 = vadd.f32 %v213_v26, %v2975_v34 }
  0xe0   :  { %v128_v47 = vpop.f32.mrb[2].mxu0 }
  0xe1   :  { %234 = vrot.lane.b32.xlu0 %v232_v27, %s2824_s24  ;;  %v2212_v36 = vmul.f32 -1.442695, %v217_v35  ;;  %v130_v48 = vpop.f32.mrb[3].mxu0  ;;  %v3015_v1 = vadd.f32 %v128_v47, %v42_v33 }
  0xe2   :  { %v3029_v17 = vadd.f32 %v130_v48, %v3026_v16 }
  0xe3   :  { %2669 = vpow2.f32 %v2212_v36 }
  0xe4   :  { %v318_v49 = vpop.f32.mrb[4].mxu0 }
  0xe5   :  { %v2370_v50 = vpop.f32.mrb[5].mxu0  ;;  %v323_v62 = vrot.slane %v318_v49, 2 }
  0xed   :  { %v2670_v37 = vpop.eup %2669 }
  0xee   :  { %v221_v38 = vadd.f32 1.0, %v2670_v37 }
  0xf0   :  { %2671 = vrcp.f32 %v221_v38 }
  0xfa   :  { %v2672_v41 = vpop.eup %2671 }
  0xfb   :  { %v244_v53 = vsub.f32 1.0, %v2672_v41  ;;  %v250_v56 = vmul.f32 0.0, %v2672_v41 }
 0x153   :  { %v235_v42 = vpop.permute.xlu0 %234 }
 0x154   :  { %v237_v43 = vmul.f32 %v2672_v41, %v235_v42 }
 0x156   :  { %239 = vrot.lane.b32.xlu1 %v237_v43, %s2824_s24 }
 0x15a   :  { %373 = vperm.xlu1 %2667, %v371_v44  }
 0x1c8   :  { %v240_v45 = vpop.permute.xlu1 %239 }
 0x1c9   :  { %v242_v46 = vadd.f32 %v240_v45, %v2975_v34 }
 0x1cb   :  { %2673 = vtanh.f32 %v242_v46 }
 0x1d5   :  { %v2674_v51 = vpop.eup %2673 }
 0x1d6   :  { %246 = vrot.lane.b32.xlu0 %v2674_v51, %s2826_s1 }
 0x1d9   :  { %v2994_v54 = vpop.permute.xlu1 %373 }
 0x1da   :  { %346 = vrot.lane.b32.xlu0 %v2216_v52, %s2824_s24  ;;  %vm375_vm3 = vcmp.eq.s32.totalorder %v2994_v54, 1 }
 0x248   :  { %v247_v55 = vpop.permute.xlu0 %246 }
 0x249   :  { %v249_v57 = vmul.f32 %v247_v55, %v244_v53  ;;  %v611_v53 = vsel %vm610_vm7, 1, %v2825_v39 }
 0x24b   :  { %v251_v58 = vadd.f32 %v250_v56, %v249_v57 }
 0x24c   :  { %v2997_v59 = vpop.permute.xlu0 %346 }
 0x24d   :  { %v3001_v60 = vsel %vm375_vm3, %v251_v58, 0.0  ;;  %v349_v61 = vadd.f32 %v2997_v59, %v318_v49 }
 0x24e   :  { %388 = vrot.lane.b32.xlu1 %v3001_v60, %s2826_s1 }
 0x24f   :  { %v351_v63 = vrot.slane %v349_v61, 2 }
 0x251   :  { %352 = vrot.lane.b32.xlu0 %v351_v63, %s2827_s5  ;;  %v491_v63 = vrot.slane %v3001_v60, 6 }
 0x252   :  { %324 = vrot.lane.b32.xlu1 %v323_v62, %s2826_s1 }
 0x255   :  { %380 = vperm.xlu0 %2668, %v378_v10  }
 0x2c0   :  { %v3008_v0 = vpop.permute.xlu1 %388 }
 0x2c1   :  { %2380 = vmatmul.mubr.msk.f32.vlgmr.msra.gmra.mrb[2].mxu1 %vm143_vm4, %v3008_v0 }
 0x2c2   :  { %2577 = vmatpush3.bf16.msra.mxu1 %v2884_v4  ;;  %2401 = vmatprep.mubr.msk.f32.mxu1 %vm2823_vm0, %v2822_v8 }
 0x2c3   :  { %2578 = vmatprep.subr.bf16.mxu1 %v2821_v3  ;;  %v353_v11 = vpop.permute.xlu0 %352 }
 0x2c4   :  { %v325_v2 = vpop.permute.xlu1 %324 }
 0x2c5   :  { %v327_v5 = vadd.f32 %v325_v2, %v3015_v1  ;;  %v334_v29 = vadd.f32 %v325_v2, %v3029_v17 }
 0x2c6   :  { %2580 = vmatpush3.bf16.msra.mxu1 %v2905_v13 }
 0x2c7   :  { %v2214_v6 = vmul.f32 -1.442695, %v327_v5  ;;  %2587 = vmatprep.subr.bf16.mxu1 %v2821_v3  ;;  %v2215_v30 = vmul.f32 -1.442695, %v334_v29 }
 0x2c9   :  { %2675 = vpow2.f32 %v2214_v6 }
 0x2d3   :  { %v2676_v7 = vpop.eup %2675 }
 0x2d4   :  { %v331_v9 = vadd.f32 1.0, %v2676_v7  ;;  %v3036_v41 = vpop.permute.xlu0 %380 }
 0x2d5   :  { %vm382_vm6 = vcmp.eq.s32.totalorder %v3036_v41, 1 }
 0x2d6   :  { %2677 = vrcp.f32 %v331_v9 }
 0x2e0   :  { %v2678_v12 = vpop.eup %2677 }
 0x2e1   :  { %v355_v14 = vmul.f32 %v2678_v12, %v353_v11 }
 0x2e3   :  { %357 = vrot.lane.b32.xlu1 %v355_v14, %s2824_s24  ;;  %v624_v14 = vsel %vm623_vm8, 1, %v2825_v39 }
 0x355   :  { %v358_v18 = vpop.permute.xlu1 %357 }
 0x356   :  { %v360_v20 = vadd.f32 %v358_v18, %v3029_v17 }
 0x358   :  { %2679 = vtanh.f32 %v360_v20 }
 0x359   :  { %2681 = vpow2.f32 %v2215_v30 }
 0x362   :  { %v2680_v21 = vpop.eup %2679 }
 0x363   :  { %364 = vrot.lane.b32.xlu1 %v2680_v21, %s2826_s1  ;;  %v2682_v31 = vpop.eup %2681 }
 0x364   :  { %v338_v32 = vadd.f32 1.0, %v2682_v31 }
 0x366   :  { %2683 = vrcp.f32 %v338_v32 }
 0x370   :  { %v2684_v33 = vpop.eup %2683 }
 0x371   :  { %v362_v35 = vsub.f32 1.0, %v2684_v33  ;;  %v368_v37 = vmul.f32 0.0, %v2684_v33 }
 0x394   :  { %v458_v23 = vpop.f32.mrb[2].mxu1 }
 0x395   :  { %v472_v26 = vadd.f32 %v458_v23, %v2951_v24  ;;  %v2381_v27 = vpop.f32.mrb[3].mxu1  ;;  %v463_v45 = vrot.slane %v458_v23, 6 }
 0x397   :  { %v474_v28 = vrot.slane %v472_v26, 6  ;;  %v465_v46 = vadd.f32 %v463_v45, %v2975_v34 }
 0x399   :  { %475 = vrot.lane.b32.xlu1 %v474_v28, %s2824_s24  ;;  %v2218_v47 = vmul.f32 -1.442695, %v465_v46 }
 0x39b   :  { %2685 = vpow2.f32 %v2218_v47 }
 0x3a5   :  { %v2686_v48 = vpop.eup %2685 }
 0x3a6   :  { %v469_v49 = vadd.f32 1.0, %v2686_v48 }
 0x3a8   :  { %2687 = vrcp.f32 %v469_v49 }
 0x3b2   :  { %v2688_v50 = vpop.eup %2687 }
 0x3b3   :  { %v485_v2 = vsub.f32 1.0, %v2688_v50  ;;  %v493_v7 = vmul.f32 %v2688_v50, %v491_v63 }
 0x3d5   :  { %v365_v36 = vpop.permute.xlu1 %364 }
 0x3d6   :  { %v367_v38 = vmul.f32 %v365_v36, %v362_v35 }
 0x3d8   :  { %v369_v42 = vadd.f32 %v368_v37, %v367_v38 }
 0x3da   :  { %v384_v43 = vrot.slane %v369_v42, 6 }
 0x3dc   :  { %v3041_v44 = vsel %vm382_vm6, %v384_v43, 0.0 }
 0x3dd   :  { %2391 = vmatmul.mubr.msk.f32.vlgmr.msra.gmra.mrb[6].mxu0 %vm143_vm4, %v3041_v44  ;;  %v606_v47 = vrot.slane %v3041_v44, 4 }
 0x3de   :  { %2583 = vmatpush3.bf16.msra.mxu0 %v2936_v19  ;;  %2412 = vmatprep.mubr.msk.f32.mxu0 %vm2823_vm0, %v2822_v8 }
 0x3df   :  { %2584 = vmatprep.subr.bf16.mxu0 %v2821_v3 }
 0x3e2   :  { %2586 = vmatpush3.bf16.msra.mxu0 %v2948_v22 }
 0x3e3   :  { %2593 = vmatprep.subr.bf16.mxu0 %v2821_v3 }
 0x40b   :  { %v476_v51 = vpop.permute.xlu1 %475 }
 0x40c   :  { %v478_v52 = vmul.f32 %v2688_v50, %v476_v51 }
 0x40e   :  { %480 = vrot.lane.b32.xlu0 %v478_v52, %s2824_s24 }
 0x412   :  { %613 = vperm.xlu0 %2668, %v611_v53  }
 0x480   :  { %v481_v55 = vpop.permute.xlu0 %480 }
 0x481   :  { %v483_v56 = vadd.f32 %v481_v55, %v2975_v34 }
 0x483   :  { %2689 = vtanh.f32 %v483_v56 }
 0x48d   :  { %v2690_v57 = vpop.eup %2689 }
 0x48e   :  { %487 = vrot.lane.b32.xlu1 %v2690_v57, %s2826_s1 }
 0x491   :  { %v3064_v15 = vpop.permute.xlu0 %613 }
 0x492   :  { %vm615_vm9 = vcmp.eq.s32.totalorder %v3064_v15, 1 }
 0x4b0   :  { %v564_v58 = vpop.f32.mrb[6].mxu0 }
 0x4b1   :  { %v569_v61 = vrot.slane %v564_v58, 4  ;;  %v2392_v62 = vpop.f32.mrb[7].mxu0  ;;  %v587_v10 = vadd.f32 %v564_v58, %v2997_v59 }
 0x4b3   :  { %570 = vrot.lane.b32.xlu0 %v569_v61, %s2826_s1  ;;  %v589_v12 = vrot.slane %v587_v10, 4 }
 0x500   :  { %v488_v5 = vpop.permute.xlu1 %487 }
 0x501   :  { %v490_v6 = vmul.f32 %v488_v5, %v485_v2 }
 0x503   :  { %v494_v9 = vadd.f32 %v493_v7, %v490_v6 }
 0x505   :  { %v617_v11 = vrot.slane %v494_v9, 2 }
 0x507   :  { %618 = vrot.lane.b32.xlu1 %v617_v11, %s2826_s1  ;;  %v857_v11 = vsel %vm856_vm11, 1, %v2825_v39 }
 0x50b   :  { %590 = vrot.lane.b32.xlu1 %v589_v12, %s2827_s5 }
 0x50f   :  { %626 = vperm.xlu1 %2667, %v624_v14  }
 0x525   :  { %v571_v60 = vpop.permute.xlu0 %570 }
 0x526   :  { %v573_v18 = vadd.f32 %v571_v60, %v3015_v1  ;;  %v580_v33 = vadd.f32 %v571_v60, %v3029_v17 }
 0x528   :  { %v2220_v20 = vmul.f32 -1.442695, %v573_v18  ;;  %v2221_v36 = vmul.f32 -1.442695, %v580_v33 }
 0x52a   :  { %2691 = vpow2.f32 %v2220_v20 }
 0x534   :  { %v2692_v21 = vpop.eup %2691 }
 0x535   :  { %v577_v23 = vadd.f32 1.0, %v2692_v21  ;;  %v869_v21 = vsel %vm868_vm12, 1, %v2825_v39 }
 0x537   :  { %2693 = vrcp.f32 %v577_v23 }
 0x541   :  { %v2694_v28 = vpop.eup %2693 }
 0x579   :  { %v619_v26 = vpop.permute.xlu1 %618 }
 0x57a   :  { %v3071_v27 = vsel %vm615_vm9, %v619_v26, %v3008_v0 }
 0x57b   :  { %2402 = vmatmul.mubr.msk.f32.vlgmr.msra.gmra.mrb[4].mxu1 %vm143_vm4, %v3071_v27  ;;  %v735_v6 = vrot.slane %v3071_v27, 4 }
 0x57c   :  { %2589 = vmatpush3.bf16.msra.mxu1 %v2884_v4  ;;  %2423 = vmatprep.mubr.msk.f32.mxu1 %vm2823_vm0, %v2822_v8 }
 0x57d   :  { %v591_v29 = vpop.permute.xlu1 %590  ;;  %2590 = vmatprep.subr.bf16.mxu1 %v2821_v3 }
 0x57e   :  { %v593_v30 = vmul.f32 %v2694_v28, %v591_v29 }
 0x580   :  { %595 = vrot.lane.b32.xlu0 %v593_v30, %s2824_s24  ;;  %2592 = vmatpush3.bf16.msra.mxu1 %v2905_v13 }
 0x581   :  { %2599 = vmatprep.subr.bf16.mxu1 %v2821_v3 }
 0x58e   :  { %v3088_v52 = vpop.permute.xlu1 %626 }
 0x58f   :  { %vm628_vm10 = vcmp.eq.s32.totalorder %v3088_v52, 1 }
 0x5f2   :  { %v596_v0 = vpop.permute.xlu0 %595 }
 0x5f3   :  { %v598_v31 = vadd.f32 %v596_v0, %v3029_v17 }
 0x5f5   :  { %2695 = vtanh.f32 %v598_v31 }
 0x5f6   :  { %2697 = vpow2.f32 %v2221_v36 }
 0x5ff   :  { %v2696_v32 = vpop.eup %2695 }
 0x600   :  { %602 = vrot.lane.b32.xlu0 %v2696_v32, %s2826_s1  ;;  %v2698_v43 = vpop.eup %2697 }
 0x601   :  { %v584_v45 = vadd.f32 1.0, %v2698_v43 }
 0x603   :  { %2699 = vrcp.f32 %v584_v45 }
 0x60d   :  { %v2700_v46 = vpop.eup %2699 }
 0x60e   :  { %v600_v48 = vsub.f32 1.0, %v2700_v46  ;;  %v608_v50 = vmul.f32 %v2700_v46, %v606_v47 }
 0x64e   :  { %v702_v35 = vpop.f32.mrb[4].mxu1 }
 0x64f   :  { %v716_v37 = vadd.f32 %v702_v35, %v2951_v24  ;;  %v2403_v38 = vpop.f32.mrb[5].mxu1  ;;  %v707_v57 = vrot.slane %v702_v35, 4 }
 0x651   :  { %v718_v42 = vrot.slane %v716_v37, 4  ;;  %v709_v58 = vadd.f32 %v707_v57, %v2975_v34 }
 0x653   :  { %719 = vrot.lane.b32.xlu1 %v718_v42, %s2824_s24  ;;  %v2223_v61 = vmul.f32 -1.442695, %v709_v58 }
 0x655   :  { %2701 = vpow2.f32 %v2223_v61 }
 0x672   :  { %v603_v49 = vpop.permute.xlu0 %602 }
 0x673   :  { %v605_v51 = vmul.f32 %v603_v49, %v600_v48 }
 0x675   :  { %v609_v53 = vadd.f32 %v608_v50, %v605_v51 }
 0x677   :  { %v630_v55 = vrot.slane %v609_v53, 4 }
 0x679   :  { %v3094_v56 = vsel %vm628_vm10, %v630_v55, %v3041_v44  ;;  %v2702_v44 = vpop.eup %2701 }
 0x67a   :  { %2413 = vmatmul.mubr.msk.f32.vlgmr.msra.gmra.mrb[8].mxu0 %vm143_vm4, %v3094_v56  ;;  %v713_v62 = vadd.f32 1.0, %v2702_v44  ;;  %v852_v61 = vrot.slane %v3094_v56, 6 }
 0x67b   :  { %2595 = vmatpush3.bf16.msra.mxu0 %v2936_v19  ;;  %2434 = vmatprep.mubr.msk.f32.mxu0 %vm2823_vm0, %v2822_v8 }
 0x67c   :  { %2596 = vmatprep.subr.bf16.mxu0 %v2821_v3  ;;  %2703 = vrcp.f32 %v713_v62 }
 0x67f   :  { %2598 = vmatpush3.bf16.msra.mxu0 %v2948_v22 }
 0x680   :  { %2605 = vmatprep.subr.bf16.mxu0 %v2821_v3 }
 0x686   :  { %v2704_v63 = vpop.eup %2703 }
 0x687   :  { %v729_v26 = vsub.f32 1.0, %v2704_v63 }
 0x6c5   :  { %v720_v2 = vpop.permute.xlu1 %719 }
 0x6c6   :  { %v722_v5 = vmul.f32 %v2704_v63, %v720_v2 }
 0x6c8   :  { %724 = vrot.lane.b32.xlu0 %v722_v5, %s2824_s24 }
 0x6cc   :  { %736 = vrot.lane.b32.xlu0 %v735_v6, %s2827_s5 }
 0x73a   :  { %v725_v7 = vpop.permute.xlu0 %724 }
 0x73b   :  { %v727_v9 = vadd.f32 %v725_v7, %v2975_v34 }
 0x73d   :  { %2705 = vtanh.f32 %v727_v9 }
 0x73e   :  { %v737_v23 = vpop.permute.xlu0 %736 }
 0x73f   :  { %v739_v29 = vmul.f32 %v2704_v63, %v737_v23 }
 0x747   :  { %v2706_v10 = vpop.eup %2705 }
 0x748   :  { %731 = vrot.lane.b32.xlu1 %v2706_v10, %s2826_s1 }
 0x74c   :  { %859 = vperm.xlu1 %2667, %v857_v11  }
 0x74d   :  { %v810_v12 = vpop.f32.mrb[8].mxu0 }
 0x74e   :  { %v815_v14 = vrot.slane %v810_v12, 6  ;;  %v833_v60 = vadd.f32 %v810_v12, %v2997_v59  ;;  %v2414_v18 = vpop.f32.mrb[9].mxu0 }
 0x750   :  { %816 = vrot.lane.b32.xlu0 %v815_v14, %s2826_s1  ;;  %v835_v20 = vrot.slane %v833_v60, 6 }
 0x754   :  { %836 = vrot.lane.b32.xlu0 %v835_v20, %s2827_s5 }
 0x758   :  { %871 = vperm.xlu0 %2668, %v869_v21  }
 0x7ba   :  { %v732_v28 = vpop.permute.xlu1 %731 }
 0x7bb   :  { %v734_v30 = vmul.f32 %v732_v28, %v729_v26 }
 0x7bd   :  { %v740_v0 = vadd.f32 %v739_v29, %v734_v30  ;;  %v1098_v29 = vsel %vm1097_vm15, 1, %v2825_v39 }
 0x7bf   :  { %v863_v31 = vrot.slane %v740_v0, 4 }
 0x7c1   :  { %864 = vrot.lane.b32.xlu1 %v863_v31, %s2826_s1 }
 0x7c2   :  { %v817_v32 = vpop.permute.xlu0 %816 }
 0x7c3   :  { %v819_v33 = vadd.f32 %v817_v32, %v3015_v1  ;;  %v826_v50 = vadd.f32 %v817_v32, %v3029_v17 }
 0x7c5   :  { %v2225_v35 = vmul.f32 -1.442695, %v819_v33  ;;  %v2226_v51 = vmul.f32 -1.442695, %v826_v50 }
 0x7c6   :  { %v837_v42 = vpop.permute.xlu0 %836 }
 0x7c7   :  { %2707 = vpow2.f32 %v2225_v35 }
 0x7cb   :  { %v3120_v45 = vpop.permute.xlu1 %859 }
 0x7cc   :  { %vm861_vm13 = vcmp.eq.s32.totalorder %v3120_v45, 1 }
 0x7d1   :  { %v2708_v36 = vpop.eup %2707 }
 0x7d2   :  { %v823_v37 = vadd.f32 1.0, %v2708_v36 }
 0x7d4   :  { %2709 = vrcp.f32 %v823_v37 }
 0x7d7   :  { %v3140_v2 = vpop.permute.xlu0 %871 }
 0x7d8   :  { %vm873_vm14 = vcmp.eq.s32.totalorder %v3140_v2, 1 }
 0x7de   :  { %v2710_v38 = vpop.eup %2709 }
 0x7df   :  { %v839_v43 = vmul.f32 %v2710_v38, %v837_v42 }
 0x7e1   :  { %841 = vrot.lane.b32.xlu1 %v839_v43, %s2824_s24 }
 0x833   :  { %v865_v46 = vpop.permute.xlu1 %864 }
 0x834   :  { %v3126_v47 = vsel %vm861_vm13, %v865_v46, %v3071_v27 }
 0x835   :  { %2424 = vmatmul.mubr.msk.f32.vlgmr.msra.gmra.mrb[6].mxu1 %vm143_vm4, %v3126_v47  ;;  %v980_v28 = vrot.slane %v3126_v47, 2 }
 0x836   :  { %2601 = vmatpush3.bf16.msra.mxu1 %v2884_v4  ;;  %2445 = vmatprep.mubr.msk.f32.mxu1 %vm2823_vm0, %v2822_v8 }
 0x837   :  { %2602 = vmatprep.subr.bf16.mxu1 %v2821_v3 }
 0x83a   :  { %2604 = vmatpush3.bf16.msra.mxu1 %v2905_v13 }
 0x83b   :  { %2611 = vmatprep.subr.bf16.mxu1 %v2821_v3 }
 0x853   :  { %v842_v48 = vpop.permute.xlu1 %841 }
 0x854   :  { %v844_v49 = vadd.f32 %v842_v48, %v3029_v17 }
 0x856   :  { %2711 = vtanh.f32 %v844_v49 }
 0x857   :  { %2713 = vpow2.f32 %v2226_v51  ;;  %v1110_v51 = vsel %vm1109_vm1, 1, %v2825_v39 }
 0x860   :  { %v2712_v27 = vpop.eup %2711 }
 0x861   :  { %848 = vrot.lane.b32.xlu1 %v2712_v27, %s2826_s1  ;;  %v2714_v53 = vpop.eup %2713 }
 0x862   :  { %v830_v55 = vadd.f32 1.0, %v2714_v53 }
 0x864   :  { %2715 = vrcp.f32 %v830_v55 }
 0x86e   :  { %v2716_v57 = vpop.eup %2715 }
 0x86f   :  { %v846_v58 = vsub.f32 1.0, %v2716_v57  ;;  %v854_v62 = vmul.f32 %v2716_v57, %v852_v61 }
 0x8d3   :  { %v849_v44 = vpop.permute.xlu1 %848 }
 0x8d4   :  { %v851_v63 = vmul.f32 %v849_v44, %v846_v58 }
 0x8d6   :  { %v855_v5 = vadd.f32 %v854_v62, %v851_v63 }
 0x8d8   :  { %v875_v6 = vrot.slane %v855_v5, 2 }
 0x8da   :  { %v3146_v7 = vsel %vm873_vm14, %v875_v6, %v3094_v56 }
 0x8db   :  { %2435 = vmatmul.mubr.msk.f32.vlgmr.msra.gmra.mrb[10].mxu0 %vm143_vm4, %v3146_v7 }
 0x8dc   :  { %2607 = vmatpush3.bf16.msra.mxu0 %v2936_v19  ;;  %2456 = vmatprep.mubr.msk.f32.mxu0 %vm2823_vm0, %v2822_v8 }
 0x8dd   :  { %2608 = vmatprep.subr.bf16.mxu0 %v2821_v3 }
 0x8e0   :  { %2610 = vmatpush3.bf16.msra.mxu0 %v2948_v22 }
 0x8e1   :  { %2617 = vmatprep.subr.bf16.mxu0 %v2821_v3 }
 0x908   :  { %v947_v9 = vpop.f32.mrb[6].mxu1 }
 0x909   :  { %v961_v10 = vadd.f32 %v947_v9, %v2951_v24  ;;  %v2425_v11 = vpop.f32.mrb[7].mxu1  ;;  %v952_v12 = vrot.slane %v947_v9, 2 }
 0x90b   :  { %v963_v56 = vrot.slane %v961_v10, 2  ;;  %v954_v14 = vadd.f32 %v952_v12, %v2975_v34 }
 0x90d   :  { %964 = vrot.lane.b32.xlu0 %v963_v56, %s2824_s24  ;;  %v2228_v60 = vmul.f32 -1.442695, %v954_v14 }
 0x90f   :  { %2717 = vpow2.f32 %v2228_v60 }
 0x919   :  { %v2718_v18 = vpop.eup %2717 }
 0x91a   :  { %v958_v20 = vadd.f32 1.0, %v2718_v18 }
 0x91c   :  { %2719 = vrcp.f32 %v958_v20 }
 0x926   :  { %v2720_v21 = vpop.eup %2719 }
 0x927   :  { %v974_v37 = vsub.f32 1.0, %v2720_v21 }
 0x97f   :  { %v965_v23 = vpop.permute.xlu0 %964 }
 0x980   :  { %v967_v26 = vmul.f32 %v2720_v21, %v965_v23 }
 0x982   :  { %969 = vrot.lane.b32.xlu1 %v967_v26, %s2824_s24 }
 0x986   :  { %981 = vrot.lane.b32.xlu1 %v980_v28, %s2827_s5 }
 0x98a   :  { %1100 = vperm.xlu1 %2667, %v1098_v29  }
 0x9ae   :  { %v1055_v30 = vpop.f32.mrb[10].mxu0 }
 0x9af   :  { %v2436_v0 = vpop.f32.mrb[11].mxu0  ;;  %v1077_v35 = vadd.f32 %v1055_v30, %v2997_v59 }
 0x9f4   :  { %v970_v31 = vpop.permute.xlu1 %969 }
 0x9f5   :  { %v972_v32 = vadd.f32 %v970_v31, %v2975_v34 }
 0x9f7   :  { %2721 = vtanh.f32 %v972_v32 }
 0x9f8   :  { %v982_v36 = vpop.permute.xlu1 %981 }
 0x9f9   :  { %v984_v42 = vmul.f32 %v2720_v21, %v982_v36 }
 0xa01   :  { %v2722_v33 = vpop.eup %2721 }
 0xa02   :  { %976 = vrot.lane.b32.xlu0 %v2722_v33, %s2826_s1 }
 0xa06   :  { %1060 = vrot.lane.b32.xlu0 %v1055_v30, %s2826_s1 }
 0xa09   :  { %v3174_v44 = vpop.permute.xlu1 %1100 }
 0xa0a   :  { %1079 = vrot.lane.b32.xlu0 %v1077_v35, %s2827_s5  ;;  %vm1102_vm2 = vcmp.eq.s32.totalorder %v3174_v44, 1 }
 0xa74   :  { %v977_v38 = vpop.permute.xlu0 %976 }
 0xa75   :  { %v979_v43 = vmul.f32 %v977_v38, %v974_v37 }
 0xa77   :  { %v985_v46 = vadd.f32 %v984_v42, %v979_v43 }
 0xa78   :  { %v1061_v48 = vpop.permute.xlu0 %1060 }
 0xa79   :  { %v1104_v49 = vrot.slane %v985_v46, 6  ;;  %v1063_v27 = vadd.f32 %v1061_v48, %v3015_v1 }
 0xa7b   :  { %v2230_v50 = vmul.f32 -1.442695, %v1063_v27  ;;  %1105 = vrot.lane.b32.xlu1 %v1104_v49, %s2826_s1 }
 0xa7c   :  { %v1080_v58 = vpop.permute.xlu0 %1079 }
 0xa7d   :  { %2723 = vpow2.f32 %v2230_v50 }
 0xa7f   :  { %1112 = vperm.xlu1 %2667, %v1110_v51  }
 0xa87   :  { %v2724_v53 = vpop.eup %2723 }
 0xa88   :  { %v1067_v55 = vadd.f32 1.0, %v2724_v53 }
 0xa8a   :  { %2725 = vrcp.f32 %v1067_v55 }
 0xa94   :  { %v2726_v57 = vpop.eup %2725 }
 0xa95   :  { %v1082_v61 = vmul.f32 %v2726_v57, %v1080_v58 }
 0xa97   :  { %1084 = vrot.lane.b32.xlu0 %v1082_v61, %s2824_s24 }
 0xaed   :  { %v1106_v40 = vpop.permute.xlu1 %1105 }
 0xaee   :  { %v1108_v62 = vsel %vm1102_vm2, %v1106_v40, %v3126_v47  ;;  %v1070_v47 = vadd.f32 %v1061_v48, %v3029_v17 }
 0xaef   :  { %2446 = vmatmul.mubr.msk.f32.vlgmr.msra.gmra.mrb[8].mxu1 %vm143_vm4, %v1108_v62 }
 0xaf0   :  { %2613 = vmatpush3.bf16.msra.mxu1 %v2884_v4  ;;  %2467 = vmatprep.mubr.msk.f32.mxu1 %vm2823_vm0, %v2822_v8  ;;  %v2231_v6 = vmul.f32 -1.442695, %v1070_v47  ;;  %v3222_v47 = vadd.f32 %v2953_v25, %v3026_v16 }
 0xaf1   :  { %2614 = vmatprep.subr.bf16.mxu1 %v2821_v3 }
 0xaf4   :  { %2616 = vmatpush3.bf16.msra.mxu1 %v2905_v13 }
 0xaf5   :  { %2623 = vmatprep.subr.bf16.mxu1 %v2821_v3 }
 0xafe   :  { %v1113_v14 = vpop.permute.xlu1 %1112 }
 0xaff   :  { %vm1114_vm5 = vcmp.eq.s32.totalorder %v1113_v14, 1 }
 0xb09   :  { %v1085_v39 = vpop.permute.xlu0 %1084 }
 0xb0a   :  { %v1087_v63 = vadd.f32 %v1085_v39, %v3029_v17 }
 0xb0c   :  { %2727 = vtanh.f32 %v1087_v63 }
 0xb0d   :  { %2729 = vpow2.f32 %v2231_v6 }
 0xb16   :  { %v2728_v5 = vpop.eup %2727 }
 0xb17   :  { %1091 = vrot.lane.b32.xlu0 %v2728_v5, %s2826_s1  ;;  %v2730_v9 = vpop.eup %2729 }
 0xb18   :  { %v1074_v10 = vadd.f32 1.0, %v2730_v9 }
 0xb1a   :  { %2731 = vrcp.f32 %v1074_v10 }
 0xb24   :  { %v2732_v11 = vpop.eup %2731 }
 0xb25   :  { %v1089_v56 = vsub.f32 1.0, %v2732_v11  ;;  %v1095_v60 = vmul.f32 %v2732_v11, %v3146_v7 }
 0xb89   :  { %v1092_v12 = vpop.permute.xlu0 %1091 }
 0xb8a   :  { %v1094_v18 = vmul.f32 %v1092_v12, %v1089_v56 }
 0xb8c   :  { %v1096_v20 = vadd.f32 %v1095_v60, %v1094_v18 }
 0xb8e   :  { %v3193_v21 = vsel %vm1114_vm5, %v1096_v20, %v3146_v7 }
 0xb8f   :  { %2457 = vmatmul.mubr.msk.f32.vlgmr.msra.gmra.mrb[12].mxu0 %vm143_vm4, %v3193_v21  ;;  %v1330_v18 = vrot.slane %v3193_v21, 2 }
 0xb90   :  { %2619 = vmatpush3.bf16.msra.mxu0 %v2936_v19  ;;  %2478 = vmatprep.mubr.msk.f32.mxu0 %vm2823_vm0, %v2822_v8 }
 0xb91   :  { %2620 = vmatprep.subr.bf16.mxu0 %v2821_v3 }
 0xb94   :  { %2622 = vmatpush3.bf16.msra.mxu0 %v2948_v22 }
 0xb95   :  { %2629 = vmatprep.subr.bf16.mxu0 %v2821_v3 }
 0xbc2   :  { %v1185_v17 = vpop.f32.mrb[8].mxu1 }
 0xbc3   :  { %v1196_v23 = vadd.f32 %v1185_v17, %v2951_v24  ;;  %v2447_v26 = vpop.f32.mrb[9].mxu1  ;;  %v1189_v7 = vadd.f32 %v1185_v17, %v3015_v1 }
 0xbc5   :  { %1198 = vrot.lane.b32.xlu1 %v1196_v23, %s2824_s24  ;;  %v2233_v28 = vmul.f32 -1.442695, %v1189_v7 }
 0xbc7   :  { %2733 = vpow2.f32 %v2233_v28 }
 0xbd1   :  { %v2734_v29 = vpop.eup %2733 }
 0xbd2   :  { %v1193_v30 = vadd.f32 1.0, %v2734_v29 }
 0xbd4   :  { %2735 = vrcp.f32 %v1193_v30 }
 0xbde   :  { %v2736_v0 = vpop.eup %2735 }
 0xbdf   :  { %v1208_v55 = vsub.f32 1.0, %v2736_v0 }
 0xc37   :  { %v1199_v31 = vpop.permute.xlu1 %1198 }
 0xc38   :  { %v1201_v32 = vmul.f32 %v2736_v0, %v1199_v31 }
 0xc3a   :  { %1203 = vrot.lane.b32.xlu0 %v1201_v32, %s2824_s24 }
 0xc62   :  { %v1288_v33 = vpop.f32.mrb[12].mxu0 }
 0xc63   :  { %v1293_v35 = vrot.slane %v1288_v33, 2  ;;  %v2458_v36 = vpop.f32.mrb[13].mxu0  ;;  %v1311_v42 = vadd.f32 %v1288_v33, %v2997_v59 }
 0xc65   :  { %1294 = vrot.lane.b32.xlu1 %v1293_v35, %s2826_s1  ;;  %v1313_v46 = vrot.slane %v1311_v42, 2 }
 0xc69   :  { %1214 = vrot.lane.b32.xlu1 %v1108_v62, %s2827_s5 }
 0xcac   :  { %v1204_v37 = vpop.permute.xlu0 %1203 }
 0xcad   :  { %v1206_v38 = vadd.f32 %v1204_v37, %v3015_v1 }
 0xcaf   :  { %2737 = vtanh.f32 %v1206_v38 }
 0xcb9   :  { %v2738_v43 = vpop.eup %2737 }
 0xcba   :  { %1210 = vrot.lane.b32.xlu0 %v2738_v43, %s2826_s1 }
 0xcbe   :  { %1314 = vrot.lane.b32.xlu0 %v1313_v46, %s2827_s5 }
 0xcd7   :  { %v1295_v48 = vpop.permute.xlu1 %1294 }
 0xcd8   :  { %v1297_v49 = vadd.f32 %v1295_v48, %v2975_v34  ;;  %v1304_v16 = vadd.f32 %v1295_v48, %v3222_v47 }
 0xcda   :  { %v2235_v27 = vmul.f32 -1.442695, %v1297_v49  ;;  %v2236_v11 = vmul.f32 -1.442695, %v1304_v16 }
 0xcdb   :  { %v1215_v53 = vpop.permute.xlu1 %1214 }
 0xcdc   :  { %2739 = vpow2.f32 %v2235_v27  ;;  %v1217_v58 = vmul.f32 %v2736_v0, %v1215_v53 }
 0xce6   :  { %v2740_v50 = vpop.eup %2739 }
 0xce7   :  { %v1301_v51 = vadd.f32 1.0, %v2740_v50 }
 0xce9   :  { %2741 = vrcp.f32 %v1301_v51 }
 0xcf3   :  { %v2742_v62 = vpop.eup %2741 }
 0xd2c   :  { %v1211_v57 = vpop.permute.xlu0 %1210 }
 0xd2d   :  { %v1213_v61 = vmul.f32 %v1211_v57, %v1208_v55 }
 0xd2f   :  { %v1218_v40 = vadd.f32 %v1217_v58, %v1213_v61 }
 0xd30   :  { %v1315_v39 = vpop.permute.xlu0 %1314 }
 0xd31   :  { %v1317_v63 = vmul.f32 %v2742_v62, %v1315_v39  ;;  %v3215_v5 = vsel %vm1114_vm5, %v1218_v40, %v1215_v53 }
 0xd32   :  { %1340 = vrot.lane.b32.xlu1 %v3215_v5, %s2826_s1 }
 0xd33   :  { %1319 = vrot.lane.b32.xlu0 %v1317_v63, %s2824_s24  ;;  %v1443_v63 = vrot.slane %v3215_v5, 6 }
 0xda4   :  { %v3224_v6 = vpop.permute.xlu1 %1340 }
 0xda5   :  { %v1320_v9 = vpop.permute.xlu0 %1319  ;;  %2468 = vmatmul.mubr.msk.f32.vlgmr.msra.gmra.mrb[10].mxu1 %vm143_vm4, %v3224_v6 }
 0xda6   :  { %v1322_v10 = vadd.f32 %v1320_v9, %v3222_v47  ;;  %2625 = vmatpush3.bf16.msra.mxu1 %v2884_v4  ;;  %2489 = vmatprep.mubr.msk.f32.mxu1 %vm2823_vm0, %v2822_v8 }
 0xda7   :  { %2626 = vmatprep.subr.bf16.mxu1 %v2821_v3 }
 0xda8   :  { %2743 = vtanh.f32 %v1322_v10 }
 0xda9   :  { %2745 = vpow2.f32 %v2236_v11 }
 0xdaa   :  { %2628 = vmatpush3.bf16.msra.mxu1 %v2905_v13 }
 0xdab   :  { %2635 = vmatprep.subr.bf16.mxu1 %v2821_v3 }
 0xdb2   :  { %v2744_v25 = vpop.eup %2743 }
 0xdb3   :  { %1326 = vrot.lane.b32.xlu1 %v2744_v25, %s2826_s1  ;;  %v2746_v56 = vpop.eup %2745 }
 0xdb4   :  { %v1308_v12 = vadd.f32 1.0, %v2746_v56 }
 0xdb6   :  { %2747 = vrcp.f32 %v1308_v12 }
 0xdc0   :  { %v2748_v14 = vpop.eup %2747 }
 0xdc1   :  { %v1324_v60 = vsub.f32 1.0, %v2748_v14  ;;  %v1332_v17 = vmul.f32 %v2748_v14, %v1330_v18 }
 0xe25   :  { %v1327_v20 = vpop.permute.xlu1 %1326 }
 0xe26   :  { %v1329_v23 = vmul.f32 %v1327_v20, %v1324_v60 }
 0xe28   :  { %v1333_v26 = vadd.f32 %v1332_v17, %v1329_v23 }
 0xe2a   :  { %v1336_v7 = vrot.slane %v1333_v26, 6 }
 0xe2c   :  { %v3241_v28 = vsel %vm1102_vm2, %v1336_v7, %v3193_v21 }
 0xe2d   :  { %2479 = vmatmul.mubr.msk.f32.vlgmr.msra.gmra.mrb[14].mxu0 %vm143_vm4, %v3241_v28  ;;  %v1558_v7 = vrot.slane %v3241_v28, 4 }
 0xe2e   :  { %2631 = vmatpush3.bf16.msra.mxu0 %v2936_v19  ;;  %2500 = vmatprep.mubr.msk.f32.mxu0 %vm2823_vm0, %v2822_v8 }
 0xe2f   :  { %2632 = vmatprep.subr.bf16.mxu0 %v2821_v3 }
 0xe32   :  { %2634 = vmatpush3.bf16.msra.mxu0 %v2948_v22 }
 0xe33   :  { %2641 = vmatprep.subr.bf16.mxu0 %v2821_v3 }
 0xe78   :  { %v1410_v29 = vpop.f32.mrb[10].mxu1 }
 0xe79   :  { %v1424_v30 = vadd.f32 %v1410_v29, %v2951_v24  ;;  %v2469_v44 = vpop.f32.mrb[11].mxu1  ;;  %v1415_v0 = vrot.slane %v1410_v29, 6 }
 0xe7b   :  { %v1426_v21 = vrot.slane %v1424_v30, 6  ;;  %v1417_v31 = vadd.f32 %v1415_v0, %v3015_v1 }
 0xe7d   :  { %1427 = vrot.lane.b32.xlu0 %v1426_v21, %s2824_s24  ;;  %v2238_v32 = vmul.f32 -1.442695, %v1417_v31 }
 0xe7f   :  { %2749 = vpow2.f32 %v2238_v32 }
 0xe89   :  { %v2750_v33 = vpop.eup %2749 }
 0xe8a   :  { %v1421_v35 = vadd.f32 1.0, %v2750_v33 }
 0xe8c   :  { %2751 = vrcp.f32 %v1421_v35 }
 0xe96   :  { %v2752_v36 = vpop.eup %2751 }
 0xe97   :  { %v1437_v9 = vsub.f32 1.0, %v2752_v36  ;;  %v1445_v16 = vmul.f32 %v2752_v36, %v1443_v63 }
 0xeef   :  { %v1428_v37 = vpop.permute.xlu0 %1427 }
 0xef0   :  { %v1430_v38 = vmul.f32 %v2752_v36, %v1428_v37 }
 0xef2   :  { %1432 = vrot.lane.b32.xlu1 %v1430_v38, %s2824_s24 }
 0xf00   :  { %v1516_v42 = vpop.f32.mrb[14].mxu0 }
 0xf01   :  { %v1521_v43 = vrot.slane %v1516_v42, 4  ;;  %v1539_v46 = vadd.f32 %v1516_v42, %v2997_v59  ;;  %v2480_v48 = vpop.f32.mrb[15].mxu0 }
 0xf03   :  { %v1541_v49 = vrot.slane %v1539_v46, 4  ;;  %1522 = vrot.lane.b32.xlu0 %v1521_v43, %s2826_s1 }
 0xf05   :  { %1542 = vrot.lane.b32.xlu1 %v1541_v49, %s2827_s5 }
 0xf64   :  { %v1433_v27 = vpop.permute.xlu1 %1432 }
 0xf65   :  { %v1435_v50 = vadd.f32 %v1433_v27, %v3015_v1 }
 0xf67   :  { %2753 = vtanh.f32 %v1435_v50 }
 0xf71   :  { %v2754_v51 = vpop.eup %2753 }
 0xf72   :  { %1439 = vrot.lane.b32.xlu0 %v2754_v51, %s2826_s1 }
 0xf75   :  { %v1523_v53 = vpop.permute.xlu0 %1522 }
 0xf76   :  { %v1525_v55 = vadd.f32 %v1523_v53, %v2975_v34  ;;  %v1532_v20 = vadd.f32 %v1523_v53, %v3222_v47 }
 0xf77   :  { %v1543_v62 = vpop.permute.xlu1 %1542 }
 0xf78   :  { %v2240_v57 = vmul.f32 -1.442695, %v1525_v55  ;;  %v2241_v17 = vmul.f32 -1.442695, %v1532_v20 }
 0xf7a   :  { %2755 = vpow2.f32 %v2240_v57 }
 0xf84   :  { %v2756_v58 = vpop.eup %2755 }
 0xf85   :  { %v1529_v61 = vadd.f32 1.0, %v2756_v58 }
 0xf87   :  { %2757 = vrcp.f32 %v1529_v61 }
 0xf91   :  { %v2758_v40 = vpop.eup %2757 }
 0xf92   :  { %v1545_v39 = vmul.f32 %v2758_v40, %v1543_v62 }
 0xf94   :  { %1547 = vrot.lane.b32.xlu1 %v1545_v39, %s2824_s24 }
 0xfe4   :  { %v1440_v10 = vpop.permute.xlu0 %1439 }
 0xfe5   :  { %v1442_v25 = vmul.f32 %v1440_v10, %v1437_v9 }
 0xfe7   :  { %v1446_v11 = vadd.f32 %v1445_v16, %v1442_v25 }
 0xfe9   :  { %v1563_v56 = vrot.slane %v1446_v11, 2 }
 0xfeb   :  { %1564 = vrot.lane.b32.xlu0 %v1563_v56, %s2826_s1 }
0x1006   :  { %v1548_v12 = vpop.permute.xlu1 %1547 }
0x1007   :  { %v1550_v14 = vadd.f32 %v1548_v12, %v3222_v47 }
0x1009   :  { %2759 = vtanh.f32 %v1550_v14 }
0x100a   :  { %2761 = vpow2.f32 %v2241_v17 }
0x1013   :  { %v2760_v60 = vpop.eup %2759 }
0x1014   :  { %1554 = vrot.lane.b32.xlu1 %v2760_v60, %s2826_s1  ;;  %v2762_v2 = vpop.eup %2761 }
0x105d   :  { %v1565_v18 = vpop.permute.xlu0 %1564 }
0x105e   :  { %v3269_v5 = vsel %vm873_vm14, %v1565_v18, %v3224_v6  ;;  %v1536_v6 = vadd.f32 1.0, %v2762_v2 }
0x105f   :  { %2490 = vmatmul.mubr.msk.f32.vlgmr.msra.gmra.mrb[12].mxu1 %vm143_vm4, %v3269_v5  ;;  %v1675_v27 = vrot.slane %v3269_v5, 4 }
0x1060   :  { %2637 = vmatpush3.bf16.msra.mxu1 %v2884_v4  ;;  %2511 = vmatprep.mubr.msk.f32.mxu1 %vm2823_vm0, %v2822_v8  ;;  %2763 = vrcp.f32 %v1536_v6 }
0x1061   :  { %2638 = vmatprep.subr.bf16.mxu1 %v2821_v3 }
0x1064   :  { %2640 = vmatpush3.bf16.msra.mxu1 %v2905_v13 }
0x1065   :  { %2647 = vmatprep.subr.bf16.mxu1 %v2821_v3 }
0x106a   :  { %v2764_v23 = vpop.eup %2763 }
0x106b   :  { %v1552_v26 = vsub.f32 1.0, %v2764_v23  ;;  %v1560_v4 = vmul.f32 %v2764_v23, %v1558_v7 }
0x1086   :  { %v1555_v29 = vpop.permute.xlu1 %1554 }
0x1087   :  { %v1557_v30 = vmul.f32 %v1555_v29, %v1552_v26 }
0x1089   :  { %v1561_v44 = vadd.f32 %v1560_v4, %v1557_v30 }
0x108b   :  { %v1570_v21 = vrot.slane %v1561_v44, 4 }
0x108d   :  { %v3284_v0 = vsel %vm861_vm13, %v1570_v21, %v3241_v28 }
0x108e   :  { %2501 = vmatmul.mubr.msk.f32.vlgmr.msra.gmra.mrb[16].mxu0 %vm143_vm4, %v3284_v0  ;;  %v1792_v4 = vrot.slane %v3284_v0, 6 }
0x108f   :  { %2643 = vmatpush3.bf16.msra.mxu0 %v2936_v19  ;;  %2522 = vmatprep.mubr.msk.f32.mxu0 %vm2823_vm0, %v2822_v8 }
0x1090   :  { %2644 = vmatprep.subr.bf16.mxu0 %v2821_v3 }
0x1093   :  { %2646 = vmatpush3.bf16.msra.mxu0 %v2948_v22 }
0x1094   :  { %2653 = vmatprep.subr.bf16.mxu0 %v2821_v3 }
0x1132   :  { %v1642_v13 = vpop.f32.mrb[12].mxu1 }
0x1133   :  { %v1656_v31 = vadd.f32 %v1642_v13, %v2951_v24  ;;  %v2491_v45 = vpop.f32.mrb[13].mxu1  ;;  %v1647_v19 = vrot.slane %v1642_v13, 4 }
0x1135   :  { %v1658_v28 = vrot.slane %v1656_v31, 4  ;;  %v1649_v36 = vadd.f32 %v1647_v19, %v3015_v1 }
0x1137   :  { %1659 = vrot.lane.b32.xlu0 %v1658_v28, %s2824_s24  ;;  %v2243_v37 = vmul.f32 -1.442695, %v1649_v36 }
0x1139   :  { %2765 = vpow2.f32 %v2243_v37 }
0x1143   :  { %v2766_v22 = vpop.eup %2765 }
0x1144   :  { %v1653_v38 = vadd.f32 1.0, %v2766_v22 }
0x1146   :  { %2767 = vrcp.f32 %v1653_v38 }
0x1150   :  { %v2768_v42 = vpop.eup %2767 }
0x1151   :  { %v1669_v10 = vsub.f32 1.0, %v2768_v42 }
0x1161   :  { %v1750_v32 = vpop.f32.mrb[16].mxu0 }
0x1162   :  { %v1755_v33 = vrot.slane %v1750_v32, 6  ;;  %v2502_v35 = vpop.f32.mrb[17].mxu0  ;;  %v1773_v46 = vadd.f32 %v1750_v32, %v2997_v59 }
0x1164   :  { %1756 = vrot.lane.b32.xlu0 %v1755_v33, %s2826_s1  ;;  %v1775_v49 = vrot.slane %v1773_v46, 6 }
0x11a9   :  { %v1660_v43 = vpop.permute.xlu0 %1659 }
0x11aa   :  { %v1662_v48 = vmul.f32 %v2768_v42, %v1660_v43 }
0x11ac   :  { %1664 = vrot.lane.b32.xlu1 %v1662_v48, %s2824_s24 }
0x11b0   :  { %1776 = vrot.lane.b32.xlu1 %v1775_v49, %s2827_s5 }
0x11b4   :  { %1676 = vrot.lane.b32.xlu1 %v1675_v27, %s2827_s5 }
0x11d6   :  { %v1757_v50 = vpop.permute.xlu0 %1756 }
0x11d7   :  { %v1759_v51 = vadd.f32 %v1757_v50, %v2975_v34  ;;  %v1766_v20 = vadd.f32 %v1757_v50, %v3222_v47 }
0x11d9   :  { %v2245_v53 = vmul.f32 -1.442695, %v1759_v51  ;;  %v2246_v17 = vmul.f32 -1.442695, %v1766_v20 }
0x11db   :  { %2769 = vpow2.f32 %v2245_v53 }
0x11e5   :  { %v2770_v55 = vpop.eup %2769 }
0x11e6   :  { %v1763_v58 = vadd.f32 1.0, %v2770_v55 }
0x121e   :  { %v1665_v57 = vpop.permute.xlu1 %1664 }
0x121f   :  { %v1667_v61 = vadd.f32 %v1665_v57, %v3015_v1  ;;  %v2253_v57 = vld [vmem:[%s3403_s6 + $0x28] sm:$0xff] }
0x1221   :  { %2771 = vtanh.f32 %v1667_v61 }
0x1222   :  { %2773 = vrcp.f32 %v1763_v58  ;;  %v1777_v62 = vpop.permute.xlu1 %1776 }
0x1226   :  { %v1677_v9 = vpop.permute.xlu1 %1676 }
0x1227   :  { %v1679_v16 = vmul.f32 %v2768_v42, %v1677_v9  ;;  %v2032_v9 = vld [vmem:[%s3403_s6] sm:$0xff] }
0x122b   :  { %v2772_v40 = vpop.eup %2771 }
0x122c   :  { %1671 = vrot.lane.b32.xlu0 %v2772_v40, %s2826_s1  ;;  %v2774_v39 = vpop.eup %2773 }
0x122d   :  { %v1779_v63 = vmul.f32 %v2774_v39, %v1777_v62  ;;  %v2255_v39 = vld [vmem:[%s3403_s6 + $0x38] sm:$0xff] }
0x1230   :  { %1781 = vrot.lane.b32.xlu0 %v1779_v63, %s2824_s24 }
0x129e   :  { %v1672_v25 = vpop.permute.xlu0 %1671 }
0x129f   :  { %v1674_v11 = vmul.f32 %v1672_v25, %v1669_v10  ;;  %v2033_v10 = vld [vmem:[%s3403_s6 + $0x8] sm:$0xff]  ;;  %v2034_v25 = vld [vmem:[%s3403_s6 + $0x10] sm:$0xff] }
0x12a1   :  { %v1680_v56 = vadd.f32 %v1679_v16, %v1674_v11  ;;  %v2654_v16 = vpack.c.bf16 %v2033_v10, %v2032_v9  ;;  %v2035_v11 = vld [vmem:[%s3403_s6 + $0x18] sm:$0xff] }
0x12a2   :  { %v1782_v12 = vpop.permute.xlu0 %1781 }
0x12a3   :  { %v1797_v14 = vrot.slane %v1680_v56, 4  ;;  %v1784_v60 = vadd.f32 %v1782_v12, %v3222_v47  ;;  %v2657_v56 = vpack.c.bf16 %v2035_v11, %v2034_v25 }
0x12a5   :  { %2775 = vtanh.f32 %v1784_v60  ;;  %1798 = vrot.lane.b32.xlu1 %v1797_v14, %s2826_s1 }
0x12a6   :  { %2777 = vpow2.f32 %v2246_v17 }
0x12af   :  { %v2776_v18 = vpop.eup %2775 }
0x12b0   :  { %1788 = vrot.lane.b32.xlu0 %v2776_v18, %s2826_s1  ;;  %v2778_v2 = vpop.eup %2777 }
0x12b1   :  { %v1770_v6 = vadd.f32 1.0, %v2778_v2 }
0x12b3   :  { %2779 = vrcp.f32 %v1770_v6 }
0x12bd   :  { %v2780_v7 = vpop.eup %2779 }
0x12be   :  { %v1786_v29 = vsub.f32 1.0, %v2780_v7  ;;  %v1794_v44 = vmul.f32 %v2780_v7, %v1792_v4 }
0x1317   :  { %v1799_v23 = vpop.permute.xlu1 %1798 }
0x1318   :  { %v3314_v26 = vsel %vm628_vm10, %v1799_v23, %v3269_v5 }
0x1319   :  { %2512 = vmatmul.mubr.msk.f32.vlgmr.msra.gmra.mrb[14].mxu1 %vm143_vm4, %v3314_v26  ;;  %v1908_v51 = vrot.slane %v3314_v26, 2 }
0x131a   :  { %2533 = vmatprep.mubr.msk.f32.mxu1 %vm2823_vm0, %v2822_v8 }
0x1322   :  { %v1789_v30 = vpop.permute.xlu0 %1788 }
0x1323   :  { %v1791_v21 = vmul.f32 %v1789_v30, %v1786_v29 }
0x1325   :  { %v1795_v13 = vadd.f32 %v1794_v44, %v1791_v21 }
0x1327   :  { %v1803_v31 = vrot.slane %v1795_v13, 2 }
0x1329   :  { %v3324_v52 = vsel %vm615_vm9, %v1803_v31, %v3284_v0 }
0x132a   :  { %2523 = vmatmul.mubr.msk.f32.vlgmr.msra.gmra.mrb[18].mxu0 %vm143_vm4, %v3324_v52 }
0x132b   :  { %2544 = vmatprep.mubr.msk.f32.mxu0 %vm2823_vm0, %v2822_v8  ;;  %2655 = vmatpush3.bf16.msra.mxu0 %v2654_v16 }
0x132c   :  { %2656 = vmatprep.subr.bf16.mxu0 %v2821_v3 }
0x132f   :  { %2658 = vmatpush3.bf16.msra.mxu0 %v2657_v56 }
0x13ec   :  { %v1875_v5 = vpop.f32.mrb[14].mxu1 }
0x13ed   :  { %v1889_v45 = vadd.f32 %v1875_v5, %v2951_v24  ;;  %v2513_v28 = vpop.f32.mrb[15].mxu1  ;;  %v1880_v0 = vrot.slane %v1875_v5, 2 }
0x13ef   :  { %v1891_v32 = vrot.slane %v1889_v45, 2  ;;  %v1882_v19 = vadd.f32 %v1880_v0, %v3015_v1 }
0x13f1   :  { %1892 = vrot.lane.b32.xlu1 %v1891_v32, %s2824_s24  ;;  %v2248_v36 = vmul.f32 -1.442695, %v1882_v19 }
0x13f3   :  { %2781 = vpow2.f32 %v2248_v36 }
0x13fd   :  { %v1983_v33 = vpop.f32.mrb[18].mxu0  ;;  %v2782_v8 = vpop.eup %2781 }
0x13fe   :  { %1988 = vrot.lane.b32.xlu0 %v1983_v33, %s2826_s1  ;;  %v2524_v35 = vpop.f32.mrb[19].mxu0  ;;  %v2005_v15 = vadd.f32 %v1983_v33, %v2997_v59  ;;  %v1886_v37 = vadd.f32 1.0, %v2782_v8 }
0x13ff   :  { %v2258_v35 = vld [vmem:[%s3404_s7] ss:$0 sm:$0xff] }
0x1400   :  { %2783 = vrcp.f32 %v1886_v37 }
0x1402   :  { %2007 = vrot.lane.b32.xlu0 %v2005_v15, %s2827_s5 }
0x140a   :  { %v2784_v24 = vpop.eup %2783 }
0x140b   :  { %v1902_v60 = vsub.f32 1.0, %v2784_v24 }
0x1463   :  { %v1893_v22 = vpop.permute.xlu1 %1892 }
0x1464   :  { %v1895_v38 = vmul.f32 %v2784_v24, %v1893_v22 }
0x1466   :  { %1897 = vrot.lane.b32.xlu1 %v1895_v38, %s2824_s24 }
0x1470   :  { %v1989_v42 = vpop.permute.xlu0 %1988 }
0x1471   :  { %v1991_v43 = vadd.f32 %v1989_v42, %v2975_v34  ;;  %v2252_v34 = vld [vmem:[%s3403_s6 + $0x20] sm:$0xff]  ;;  %v1998_v2 = vadd.f32 %v1989_v42, %v3222_v47 }
0x1472   :  { %v2648_v58 = vpack.c.bf16 %v2253_v57, %v2252_v34 }
0x1473   :  { %v2250_v46 = vmul.f32 -1.442695, %v1991_v43  ;;  %v2251_v7 = vmul.f32 -1.442695, %v1998_v2 }
0x1474   :  { %v2008_v27 = vpop.permute.xlu0 %2007  ;;  %2649 = vmatpush3.bf16.msra.mxu1 %v2648_v58 }
0x1475   :  { %2785 = vpow2.f32 %v2250_v46  ;;  %2650 = vmatprep.subr.bf16.mxu1 %v2821_v3 }
0x147f   :  { %v2786_v59 = vpop.eup %2785 }
0x1480   :  { %v1995_v48 = vadd.f32 1.0, %v2786_v59 }
0x1482   :  { %2787 = vrcp.f32 %v1995_v48 }
0x148c   :  { %v2788_v49 = vpop.eup %2787 }
0x148d   :  { %v2010_v50 = vmul.f32 %v2788_v49, %v2008_v27 }
0x148f   :  { %2012 = vrot.lane.b32.xlu1 %v2010_v50, %s2824_s24 }
0x1493   :  { %1909 = vrot.lane.b32.xlu1 %v1908_v51, %s2827_s5 }
0x14d8   :  { %v1898_v53 = vpop.permute.xlu1 %1897 }
0x14d9   :  { %v1900_v55 = vadd.f32 %v1898_v53, %v3015_v1  ;;  %v2254_v1 = vld [vmem:[%s3403_s6 + $0x30] sm:$0xff] }
0x14da   :  { %v2651_v63 = vpack.c.bf16 %v2255_v39, %v2254_v1 }
0x14db   :  { %2789 = vtanh.f32 %v1900_v55 }
0x14dc   :  { %2652 = vmatpush3.bf16.msra.mxu1 %v2651_v63 }
0x14e5   :  { %v2790_v61 = vpop.eup %2789 }
0x14e6   :  { %1904 = vrot.lane.b32.xlu0 %v2790_v61, %s2826_s1 }
0x1501   :  { %v2013_v40 = vpop.permute.xlu1 %2012 }
0x1502   :  { %v2015_v62 = vadd.f32 %v2013_v40, %v3222_v47 }
0x1504   :  { %2791 = vtanh.f32 %v2015_v62 }
0x1505   :  { %v1910_v14 = vpop.permute.xlu1 %1909  ;;  %2793 = vpow2.f32 %v2251_v7 }
0x1506   :  { %v1912_v20 = vmul.f32 %v2784_v24, %v1910_v14 }
0x150e   :  { %v2792_v12 = vpop.eup %2791 }
0x150f   :  { %2019 = vrot.lane.b32.xlu0 %v2792_v12, %s2826_s1  ;;  %v2794_v29 = vpop.eup %2793 }
0x1510   :  { %v2002_v4 = vadd.f32 1.0, %v2794_v29 }
0x1512   :  { %2795 = vrcp.f32 %v2002_v4 }
0x151c   :  { %v2796_v3 = vpop.eup %2795 }
0x151d   :  { %v2017_v30 = vsub.f32 1.0, %v2796_v3  ;;  %v2023_v21 = vmul.f32 %v2796_v3, %v3324_v52 }
0x1558   :  { %v1905_v18 = vpop.permute.xlu0 %1904 }
0x1559   :  { %v1907_v17 = vmul.f32 %v1905_v18, %v1902_v60 }
0x155b   :  { %v1913_v6 = vadd.f32 %v1912_v20, %v1907_v17 }
0x155d   :  { %v2026_v23 = vrot.slane %v1913_v6, 6 }
0x155f   :  { %2027 = vrot.lane.b32.xlu1 %v2026_v23, %s2826_s1 }
0x1581   :  { %v2020_v44 = vpop.permute.xlu0 %2019 }
0x1582   :  { %v2022_v13 = vmul.f32 %v2020_v44, %v2017_v30 }
0x1584   :  { %v2024_v31 = vadd.f32 %v2023_v21, %v2022_v13 }
0x1586   :  { %v2031_v47 = vsel %vm375_vm3, %v2024_v31, %v3324_v52 }
0x1587   :  { %2534 = vmatmul.mubr.msk.f32.vlgmr.msra.gmra.mrb[16].mxu1 %vm143_vm4, %v2031_v47 }
0x15d1   :  { %v2028_v5 = vpop.permute.xlu1 %2027 }
0x15d2   :  { %v2030_v45 = vsel %vm382_vm6, %v2028_v5, %v3314_v26 }
0x15d3   :  { %2545 = vmatmul.mubr.msk.f32.vlgmr.msra.gmra.mrb[20].mxu0 %vm143_vm4, %v2030_v45 }
0x165a   :  { %v2110_v28 = vpop.f32.mrb[16].mxu1 }
0x165b   :  { %v2535_v32 = vpop.f32.mrb[17].mxu1 }
0x16a6   :  { %v2183_v33 = vpop.f32.mrb[20].mxu0 }
0x16a7   :  { %v2184_v54 = vadd.f32 %v2183_v33, %v2110_v28  ;;  %v2546_v52 = vpop.f32.mrb[21].mxu0 }
0x16a9   :  { %v2194_v15 = vadd.f32 %v2258_v35, %v2184_v54 }
0x16ab   :  { %2195 = vst [vmem:[#allocation2] sm:$0x3] %v2194_v15 }
0x16ac   :  { %2808 = shalt.err (!%p2805_p4)
}
0x16ad   :  { %s2809_s13 = scalar_lea.hbm %s3405_s8, 32 }
0x16ae   :  { %p2810_p5 = scmp.ne.s32.totalorder %s3405_s8, %s2809_s13  ;;  %p2813_p6 = scmp.lt.u32.totalorder %s2809_s13, %s3405_s8 }
0x16b0   :  { %p2815_p7 = pnand %p2813_p6, %p2810_p5 }
0x16b2   :  { %2818 = shalt.err (!%p2815_p7)
}
0x16b3   :  { %2205 = dma.vmem_to_hbm [thread:$0]  %s2203_s11, 32, %s3405_s8, [#allocation3]  }
0x16b4   :  { %2819 = dma.done.wait [#allocation3], 32  }
0x16b5   :  { %2820 = vsyncadd [#allocation3], 4294967264 }
0x16b6   :  { %2209 = vsyncpa [#allocation3], 1 }

</bundles_post_ra>
